<compile_context>
chip_gen: v5e
topology: v5e:2x2
jax: 0.10.0
libtpu: 0.0.40
codegen_flags: <defaults>
</compile_context>

<pallas_src>
import jax
import jax.numpy as jnp
from jax.experimental import pallas as pl
from jax.experimental.pallas import tpu as pltpu

MAX_NUM_NODES = 32
NODE_FEATURE_DIM = 320
NF = MAX_NUM_NODES * NODE_FEATURE_DIM   # 10240 node-feature columns
NN = MAX_NUM_NODES * MAX_NUM_NODES      # 1024  adjacency columns

assert MAX_NUM_NODES & (MAX_NUM_NODES - 1) == 0, "diag mask assumes power-of-two N"
_SHIFT = MAX_NUM_NODES.bit_length() - 1  # log2(32) = 5

N_TILES = 2                              # 2 grid steps (one per v7x TC)
TILE_NODE = NF // N_TILES                # 5120 node columns per step
TILE_ADJ = NN // N_TILES                 # 512 adjacency columns per step
TILE_COLS = TILE_NODE + TILE_ADJ         # 5632-wide fused weight tile

assert TILE_NODE % 128 == 0 and TILE_ADJ % 128 == 0


def _decoder_kernel(z_ref, w1_ref, b1_ref, w_ref, b_ref, x_ref, adj_ref):
    # h = relu(z @ W1 + b1): tiny, recomputed per tile so the grid axis is
    # fully parallel (no shared scratch across cores).
    h = jnp.dot(z_ref[...], w1_ref[...], preferred_element_type=jnp.float32)
    h = jnp.maximum(h + b1_ref[...], 0.0)

    # Fused [node-cols | adj-cols] tile: bf16 weights, f32 accumulate.
    out = jnp.dot(h.astype(w_ref.dtype), w_ref[...],
                  preferred_element_type=jnp.float32) + b_ref[...]

    # Node-feature head: plain linear output (lane-aligned 5120-wide slice).
    x_ref[...] = out[:, :TILE_NODE]

    # Adjacency head (only the 512 adj columns of this step): sigmoid + zero
    # diagonal.  Flat adjacency index j -> row = j >> 5, col = j & 31.
    adj = out[:, TILE_NODE:]
    j = (pl.program_id(0) * TILE_ADJ
         + jax.lax.broadcasted_iota(jnp.int32, adj.shape, 1))
    is_diag = (j >> _SHIFT) == (j & (MAX_NUM_NODES - 1))
    adj_ref[...] = jnp.where(is_diag, 0.0, jax.nn.sigmoid(adj))


def pack_params(params, weight_dtype=jnp.bfloat16):
    """Pack (w1,b1,wn,bn,wa,ba) into the per-tile fused layout the kernel
    consumes: tile i = [ Wn[:, i*5120:(i+1)*5120] | Wa[:, i*512:(i+1)*512] ]."""
    w1, b1, wn, bn, wa, ba = params
    w_tiles, b_tiles = [], []
    for i in range(N_TILES):
        w_tiles.append(wn[:, i * TILE_NODE:(i + 1) * TILE_NODE])
        w_tiles.append(wa[:, i * TILE_ADJ:(i + 1) * TILE_ADJ])
        b_tiles.append(bn[:, i * TILE_NODE:(i + 1) * TILE_NODE])
        b_tiles.append(ba[:, i * TILE_ADJ:(i + 1) * TILE_ADJ])
    w_fused = jnp.concatenate(w_tiles, axis=1).astype(weight_dtype)
    b_fused = jnp.concatenate(b_tiles, axis=1).astype(jnp.float32)
    return (w1.astype(jnp.float32), b1.astype(jnp.float32), w_fused, b_fused)


@jax.jit
def decoder_forward(z, packed):
    w1, b1, w_fused, b_fused = packed
    B = z.shape[0]
    hidden = w1.shape[1]

    x_flat, adj_flat = pl.pallas_call(
        _decoder_kernel,
        out_shape=(
            jax.ShapeDtypeStruct((B, NF), jnp.float32),
            jax.ShapeDtypeStruct((B, NN), jnp.float32),
        ),
        grid=(N_TILES,),
        in_specs=[
            pl.BlockSpec(z.shape, lambda i: (0, 0)),               # z (revisited)
            pl.BlockSpec(w1.shape, lambda i: (0, 0)),              # W1
            pl.BlockSpec(b1.shape, lambda i: (0, 0)),              # b1
            pl.BlockSpec((hidden, TILE_COLS), lambda i: (0, i)),   # fused weight tile
            pl.BlockSpec((1, TILE_COLS), lambda i: (0, i)),        # fused bias tile
        ],
        out_specs=(
            pl.BlockSpec((B, TILE_NODE), lambda i: (0, i)),        # node features
            pl.BlockSpec((B, TILE_ADJ), lambda i: (0, i)),         # adjacency
        ),
        compiler_params=pltpu.CompilerParams(
            dimension_semantics=("parallel",)),
    )(z, w1, b1, w_fused, b_fused)

    # Contiguous reshapes only -- no slice copies.
    x = x_flat.reshape(B, MAX_NUM_NODES, NODE_FEATURE_DIM)
    adj = adj_flat.reshape(B, MAX_NUM_NODES, MAX_NUM_NODES)
    return x, adj


def init_params(key, latent_dim, hidden_channels):
    n = MAX_NUM_NODES
    f = NODE_FEATURE_DIM
    k1, k2, k3, k4, k5, k6 = jax.random.split(key, 6)

    def uniform(k, shape, fan_in):
        bound = 1.0 / jnp.sqrt(jnp.float32(fan_in))
        return jax.random.uniform(k, shape, jnp.float32, -bound, bound)

    w1 = uniform(k1, (latent_dim, hidden_channels), latent_dim)
    b1 = uniform(k2, (1, hidden_channels), latent_dim)
    wn = uniform(k3, (hidden_channels, n * f), hidden_channels)
    bn = uniform(k4, (1, n * f), hidden_channels)
    wa = uniform(k5, (hidden_channels, n * n), hidden_channels)
    ba = uniform(k6, (1, n * n), hidden_channels)
    return (w1, b1, wn, bn, wa, ba)


def decoder_reference(z, raw_params, weight_dtype=jnp.bfloat16):
    """Pure-JAX reference using the same bf16 weight cast as the kernel."""
    w1, b1, wn, bn, wa, ba = raw_params
    h = jax.nn.relu(z @ w1 + b1)
    h_c = h.astype(weight_dtype)
    x = jnp.dot(h_c, wn.astype(weight_dtype),
                preferred_element_type=jnp.float32) + bn
    adj = jnp.dot(h_c, wa.astype(weight_dtype),
                  preferred_element_type=jnp.float32) + ba
    x = x.reshape(-1, MAX_NUM_NODES, NODE_FEATURE_DIM)
    adj = jax.nn.sigmoid(adj).reshape(-1, MAX_NUM_NODES, MAX_NUM_NODES)
    adj = adj * (1.0 - jnp.eye(MAX_NUM_NODES, dtype=adj.dtype)[None, :, :])
    return x, adj


if __name__ == "__main__":
    latent_dim = 32
    hidden_channels = 64
    batch = 8  # one full f32 sublane tile

    key = jax.random.PRNGKey(0)
    kz, kp = jax.random.split(key)
    z = jax.random.normal(kz, (batch, latent_dim), jnp.float32)
    raw_params = init_params(kp, latent_dim, hidden_channels)
    packed = pack_params(raw_params, weight_dtype=jnp.bfloat16)

    x, adj = decoder_forward(z, packed)
    jax.block_until_ready((x, adj))

    x_ref, adj_ref = decoder_reference(z, raw_params)
    assert x.shape == (batch, MAX_NUM_NODES, NODE_FEATURE_DIM)
    assert adj.shape == (batch, MAX_NUM_NODES, MAX_NUM_NODES)
    assert jnp.allclose(x, x_ref, atol=2e-3, rtol=2e-3), \
        float(jnp.max(jnp.abs(x - x_ref)))
    assert jnp.allclose(adj, adj_ref, atol=2e-3, rtol=2e-3), \
        float(jnp.max(jnp.abs(adj - adj_ref)))

    print("KERNEL_OK")
</pallas_src>

<mosaic_0001>
module attributes {stable_mosaic.version = 11 : i64} {
  func.func @_decoder_kernel(%arg0: i32, %arg1: memref<8x32xf32, #tpu.memory_space<vmem>>, %arg2: memref<32x64xf32, #tpu.memory_space<vmem>>, %arg3: memref<1x64xf32, #tpu.memory_space<vmem>>, %arg4: memref<64x5632xbf16, #tpu.memory_space<vmem>>, %arg5: memref<1x5632xf32, #tpu.memory_space<vmem>>, %arg6: memref<8x5120xf32, #tpu.memory_space<vmem>>, %arg7: memref<8x512xf32, #tpu.memory_space<vmem>>) attributes {dimension_semantics = [#tpu.dimension_semantics<parallel>], iteration_bounds = array<i64: 2>, scalar_prefetch = 0 : i64, scratch_operands = 0 : i64, tpu.core_type = #tpu.core_type<tc>, window_params = [{pipeline_mode = #tpu.pipeline_mode<synchronous>, transform_indices = @transform_0, window_bounds = array<i64: 8, 32>}, {pipeline_mode = #tpu.pipeline_mode<synchronous>, transform_indices = @transform_1, window_bounds = array<i64: 32, 64>}, {pipeline_mode = #tpu.pipeline_mode<synchronous>, transform_indices = @transform_2, window_bounds = array<i64: 1, 64>}, {transform_indices = @transform_3, window_bounds = array<i64: 64, 5632>}, {transform_indices = @transform_4, window_bounds = array<i64: 1, 5632>}, {transform_indices = @transform_5, window_bounds = array<i64: 8, 5120>}, {transform_indices = @transform_6, window_bounds = array<i64: 8, 512>}]} {
    %c0 = arith.constant 0 : index
    %c0_0 = arith.constant 0 : index
    %0 = vector.load %arg1[%c0, %c0_0] : memref<8x32xf32, #tpu.memory_space<vmem>>, vector<8x32xf32>
    %c0_1 = arith.constant 0 : index
    %c0_2 = arith.constant 0 : index
    %1 = vector.load %arg2[%c0_1, %c0_2] : memref<32x64xf32, #tpu.memory_space<vmem>>, vector<32x64xf32>
    %cst = arith.constant dense<0.000000e+00> : vector<8x64xf32>
    %2 = tpu.matmul %0, %1, %cst {dimension_numbers = #tpu.dot_dimension_numbers<[1], [0], [0], [1], [0, 0, 1, 1], [], []>} : vector<8x32xf32>, vector<32x64xf32>, vector<8x64xf32> -> vector<8x64xf32>
    %c0_3 = arith.constant 0 : index
    %c0_4 = arith.constant 0 : index
    %3 = vector.load %arg3[%c0_3, %c0_4] : memref<1x64xf32, #tpu.memory_space<vmem>>, vector<1x64xf32>
    %4 = vector.broadcast %3 : vector<1x64xf32> to vector<8x64xf32>
    %5 = arith.addf %2, %4 : vector<8x64xf32>
    %cst_5 = arith.constant 0.000000e+00 : f32
    %6 = vector.broadcast %cst_5 : f32 to vector<8x64xf32>
    %7 = arith.maximumf %5, %6 : vector<8x64xf32>
    %8 = arith.truncf %7 : vector<8x64xf32> to vector<8x64xbf16>
    %c0_6 = arith.constant 0 : index
    %c0_7 = arith.constant 0 : index
    %9 = vector.load %arg4[%c0_6, %c0_7] : memref<64x5632xbf16, #tpu.memory_space<vmem>>, vector<64x5632xbf16>
    %cst_8 = arith.constant dense<0.000000e+00> : vector<8x5632xf32>
    %10 = tpu.matmul %8, %9, %cst_8 {dimension_numbers = #tpu.dot_dimension_numbers<[1], [0], [0], [1], [0, 0, 1, 1], [], []>} : vector<8x64xbf16>, vector<64x5632xbf16>, vector<8x5632xf32> -> vector<8x5632xf32>
    %c0_9 = arith.constant 0 : index
    %c0_10 = arith.constant 0 : index
    %11 = vector.load %arg5[%c0_9, %c0_10] : memref<1x5632xf32, #tpu.memory_space<vmem>>, vector<1x5632xf32>
    %12 = vector.broadcast %11 : vector<1x5632xf32> to vector<8x5632xf32>
    %13 = arith.addf %10, %12 : vector<8x5632xf32>
    %14 = vector.extract_strided_slice %13 {offsets = [0, 0], sizes = [8, 5120], strides = [1, 1]} : vector<8x5632xf32> to vector<8x5120xf32>
    %c0_11 = arith.constant 0 : index
    %c0_12 = arith.constant 0 : index
    %15 = vector.load %arg6[%c0_11, %c0_12] : memref<8x5120xf32, #tpu.memory_space<vmem>>, vector<8x5120xf32>
    tpu.vector_store %arg6[%c0_11, %c0_12], %14 {strides = array<i32>} : memref<8x5120xf32, #tpu.memory_space<vmem>>, vector<8x5120xf32>,
    %16 = vector.extract_strided_slice %13 {offsets = [0, 5120], sizes = [8, 512], strides = [1, 1]} : vector<8x5632xf32> to vector<8x512xf32>
    %c512_i32 = arith.constant 512 : i32
    %17 = arith.muli %arg0, %c512_i32 : i32
    %18 = tpu.iota {dimensions = array<i32: 1>} : vector<8x512xi32>
    %19 = vector.broadcast %17 : i32 to vector<8x512xi32>
    %20 = arith.addi %19, %18 : vector<8x512xi32>
    %c5_i32 = arith.constant 5 : i32
    %21 = vector.broadcast %c5_i32 : i32 to vector<8x512xi32>
    %22 = arith.shrsi %20, %21 : vector<8x512xi32>
    %c31_i32 = arith.constant 31 : i32
    %23 = vector.broadcast %c31_i32 : i32 to vector<8x512xi32>
    %24 = arith.andi %20, %23 : vector<8x512xi32>
    %25 = arith.cmpi eq, %22, %24 : vector<8x512xi32>
    %26 = arith.negf %16 : vector<8x512xf32>
    %27 = math.exp %26 : vector<8x512xf32>
    %cst_13 = arith.constant 1.000000e+00 : f32
    %28 = vector.broadcast %cst_13 : f32 to vector<8x512xf32>
    %29 = arith.addf %28, %27 : vector<8x512xf32>
    %30 = arith.divf %28, %29 : vector<8x512xf32>
    %cst_14 = arith.constant 0.000000e+00 : f32
    %31 = vector.broadcast %cst_14 : f32 to vector<8x512xf32>
    %32 = arith.select %25, %31, %30 : vector<8x512xi1>, vector<8x512xf32>
    %c0_15 = arith.constant 0 : index
    %c0_16 = arith.constant 0 : index
    %33 = vector.load %arg7[%c0_15, %c0_16] : memref<8x512xf32, #tpu.memory_space<vmem>>, vector<8x512xf32>
    tpu.vector_store %arg7[%c0_15, %c0_16], %32 {strides = array<i32>} : memref<8x512xf32, #tpu.memory_space<vmem>>, vector<8x512xf32>,
    return
  }
  func.func @transform_0(%arg0: i32) -> (i32, i32) {
    %c0_i32 = arith.constant 0 : i32
    %c0_i32_0 = arith.constant 0 : i32
    %c0_i32_1 = arith.constant 0 : i32
    return %c0_i32, %c0_i32_0 : i32, i32
  }
  func.func @transform_1(%arg0: i32) -> (i32, i32) {
    %c0_i32 = arith.constant 0 : i32
    %c0_i32_0 = arith.constant 0 : i32
    %c0_i32_1 = arith.constant 0 : i32
    return %c0_i32, %c0_i32_0 : i32, i32
  }
  func.func @transform_2(%arg0: i32) -> (i32, i32) {
    %c0_i32 = arith.constant 0 : i32
    %c0_i32_0 = arith.constant 0 : i32
    %c0_i32_1 = arith.constant 0 : i32
    return %c0_i32, %c0_i32_0 : i32, i32
  }
  func.func @transform_3(%arg0: i32) -> (i32, i32) {
    %c0_i32 = arith.constant 0 : i32
    %c0_i32_0 = arith.constant 0 : i32
    return %c0_i32, %arg0 : i32, i32
  }
  func.func @transform_4(%arg0: i32) -> (i32, i32) {
    %c0_i32 = arith.constant 0 : i32
    %c0_i32_0 = arith.constant 0 : i32
    return %c0_i32, %arg0 : i32, i32
  }
  func.func @transform_5(%arg0: i32) -> (i32, i32) {
    %c0_i32 = arith.constant 0 : i32
    %c0_i32_0 = arith.constant 0 : i32
    return %c0_i32, %arg0 : i32, i32
  }
  func.func @transform_6(%arg0: i32) -> (i32, i32) {
    %c0_i32 = arith.constant 0 : i32
    %c0_i32_0 = arith.constant 0 : i32
    return %c0_i32, %arg0 : i32, i32
  }
}

</mosaic_0001>

<bundles_post_ra>
// kernel: decoder_forward.1
= control target key start
LH: loop header
LB: loop body
LE: loop exit
PB: predicated region body
PF: predicated region fallthrough
CT: control target
= control target key end

     0   :  { %s4475_s0 = inlined_call_operand.hbm [shape: f32[8,32], index: 0, kind: input, shape index: {}]   ;;  %s4476_s1 = inlined_call_operand.hbm [shape: f32[32,64], index: 1, kind: input, shape index: {}]   ;;  %s4477_s2 = inlined_call_operand.hbm [shape: f32[1,64], index: 2, kind: input, shape index: {}]   ;;  %s4478_s3 = inlined_call_operand.hbm [shape: bf16[64,11264], index: 3, kind: input, shape index: {}]   ;;  %s4479_s4 = inlined_call_operand.hbm [shape: f32[1,11264], index: 4, kind: input, shape index: {}]   ;;  %s4480_s5 = inlined_call_operand.vmem [shape: f32[8,10240], index: 5, kind: output, shape index: {0}]   ;;  %s4481_s6 = inlined_call_operand.vmem [shape: f32[8,1024], index: 6, kind: output, shape index: {1}]  }
   0x1   :  { %4483 = sst [smem:[#allocation13_spill]] %s4475_s0 }
   0x2   :  { %4484 = sst [smem:[#allocation14_spill]] %s4476_s1 }
   0x3   :  { %4485 = sst [smem:[#allocation15_spill]] %s4478_s3 }
   0x4   :  { %12 = vsyncpa [#allocation3], 0 }
   0x5   :  { %13 = vsyncpa [#allocation5], 0 }
   0x6   :  { %14 = vsyncpa [#allocation8], 0 }
   0x7   :  { %16 = vsyncpa [#allocation8 + $0x1], 0  ;;  %s3726_s21 = smov 0   ;;  %s3728_s22 = smov 0  }
   0x8   :  { %s3730_s23 = smov 0   ;;  %s3732_s24 = smov 0  }
   0x9 LB: > { %s3745_s25 = sadd.s32 4294967295, %s3681_s24   ;;  %p105_p0 = scmp.ne.s32.totalorder %s3673_s22, %s3669_s21  ;;  %s3681_s24 = sphi %s3732_s24, %s4508_s24   ;;  %s3677_s23 = sphi %s3730_s23, %s4507_s23   ;;  %s3673_s22 = sphi %s3728_s22, %s4506_s22   ;;  %s3669_s21 = sphi %s3726_s21, %s4505_s21  }
   0xa   : > { %p106_p1 = scmp.eq.s32.totalorder %s3745_s25, 0  ;;  %p2442_p2 = scmp.ge.s32.totalorder %s3681_s24, 1 }
   0xb   : > { %p194_p3 = scmp.lt.s32.totalorder %s3681_s24, 3  ;;  %s4487_s1 = sld [smem:[#allocation14_spill]] }
   0xc   : > { %p3753_p4 = por %p106_p1, %p105_p0  ;;  %s3683_s7 = smov [#allocation4]  }
   0xd   : > { %p3760_p5 = pnand %p2442_p2, %p194_p3  ;;  %s219_s8 = sshll.u32 %s3683_s7, 4  ;;  %s220_s8 = int_to_ptr.vmem [resolvable:$true] %s219_s8 }
   0xe   : > { %s3773_s10 = sadd.s32 1, %s3681_s24   ;;  %s3684_s11 = smov 128  }
   0xf   : > { %p3408_p6 = pneg %p3760_p5  ;;  %s3685_s12 = smov 8  }
  0x10   : > { %s89_s13 = ssub.s32 %s3681_s24, %s3773_s10  ;;  %s92_s14 = sadd.s32 1, %s3677_s23 }
  0x11   : > { %s217_s29 = sshll.u32 %s4487_s1, 4  ;;  %p3768_p7 = pnand %p3408_p6, %p106_p1  ;;  %s218_s29 = int_to_ptr.hbm [resolvable:$true] %s217_s29 }
  0x12   : > { %p90_p8 = scmp.eq.s32.totalorder %s89_s13, 0  ;;  %p99_p9 = scmp.ne.s32.totalorder %s3677_s23, %s3673_s22 }
  0x13   : > { %3414 = dma.hbm_to_vmem [thread:$0]  (!%p3768_p7), %s218_s29, 512, %s220_s8, [#allocation5], %s3684_s11, %s3684_s11, %s3685_s12  }
  0x14   : > { %p100_p10 = scmp.eq.s32.totalorder %s3681_s24, 0  ;;  %p3428_p11 = scmp.lt.s32.totalorder %s3681_s24, 2 }
  0x15   : > { %s3785_s15 = scalar_select %p90_p8, %s3677_s23, %s92_s14  }
  0x16   : > { %p101_p12 = por %p100_p10, %p99_p9  ;;  %s245_s16 = sand.u32 1, %s3681_s24  }
  0x17   : > { %s4482_s17 = sand.u32 1, %s3677_s23   ;;  %s3211_s20 = smul.u32 176, %s3681_s24 }
  0x18   : > { %s3388_s18 = smul.u32 1408, %s4482_s17  ;;  %p3791_p13 = pnand %p3428_p11, %p101_p12 }
  0x19   : > { %s4491_s3 = sld [smem:[#allocation15_spill]]  ;;  %s3802_s14 = scalar_lea.sflag [#allocation8], %s245_s16 }
  0x1a   : > { %s249_s29 = scalar_lea.vmem [#allocation7], %s3388_s18  ;;  %s4492_s0 = sld [smem:[#allocation13_spill]] }
  0x1b   : > { %s257_s7 = sshll.u32 %s249_s29, 4  ;;  %p3523_p2 = pneg %p3791_p13  ;;  %s258_s7 = int_to_ptr.vmem [resolvable:$true] %s257_s7 }
  0x1f   : > { %s254_s28 = scalar_lea.hbm %s4491_s3, %s3211_s20  ;;  %s3526_s21 = scalar_lea.hbm %s4491_s3, 2816 }
  0x20   : > { %s255_s8 = sshll.u32 %s254_s28, 4  ;;  %s206_s13 = sshll.u32 %s4492_s0, 4  ;;  %s256_s8 = int_to_ptr.hbm [resolvable:$true] %s255_s8  ;;  %s207_s13 = int_to_ptr.hbm [resolvable:$true] %s206_s13 }
  0x21   : > { %s3519_s17 = sshra.s32 %s256_s8, 4  ;;  %s3520_s17 = int_to_ptr.hbm [resolvable:$true] %s3519_s17 }
  0x22   : > { %s3521_s1 = scalar_lea.hbm %s3520_s17, 1408  ;;  %p3527_p8 = scmp.lt.s32.totalorder %s3520_s17, %s4491_s3 }
  0x23   : > { %p3522_p0 = scmp.ne.s32.totalorder %s3520_s17, %s3521_s1  ;;  %p3528_p9 = scmp.lt.s32.totalorder %s3526_s21, %s3521_s1 }
  0x25   : > { %p3524_p3 = pnand %p3523_p2, %p3522_p0  ;;  %p3529_p10 = por %p3528_p9, %p3527_p8 }
  0x27   : > { %p3525_p6 = pneg %p3524_p3 }
  0x29   : > { %p3530_p11 = pnand %p3529_p10, %p3525_p6 }
  0x2b   : > { %3533 = shalt.err (!%p3530_p11)
}
  0x2c   : > { %s3686_s16 = smov 5632   ;;  %s3687_s29 = smov 2816  }
  0x2d   : > { %s3688_s11 = smov 176   ;;  %s3689_s12 = smov [#allocation2]  }
  0x2e   : > { %3421 = dma.hbm_to_vmem [thread:$0]  (!%p3791_p13), %s256_s8, 22528, %s258_s7, %s3802_s14, %s3686_s16, %s3687_s29, %s3688_s11  }
  0x2f   : > { %s208_s18 = sshll.u32 %s3689_s12, 4  ;;  %s232_s1 = sshll.u32 %s4477_s2, 4  ;;  %s209_s18 = int_to_ptr.vmem [resolvable:$true] %s208_s18  ;;  %s233_s1 = int_to_ptr.hbm [resolvable:$true] %s232_s1 }
  0x30   : > { %3411 = dma.hbm_to_vmem [thread:$0]  (!%p3768_p7), %s207_s13, 128, %s209_s18, [#allocation3]  }
  0x31   : > { %s4493_s21 = sand.u32 1, %s3677_s23   ;;  %s3690_s28 = smov [#allocation6]  }
  0x32   : > { %s3389_s27 = smul.u32 44, %s4493_s21  ;;  %s234_s0 = sshll.u32 %s3690_s28, 4  ;;  %s235_s0 = int_to_ptr.vmem [resolvable:$true] %s234_s0 }
  0x33   : > { %s272_s3 = smul.u32 44, %s3681_s24 }
  0x34   : > { %3417 = dma.hbm_to_vmem [thread:$0]  (!%p3768_p7), %s233_s1, 16, %s235_s0, [#allocation5]  }
  0x35   : > { %s275_s16 = scalar_lea.hbm %s4479_s4, %s272_s3  ;;  %s271_s29 = scalar_lea.vmem [#allocation9], %s3389_s27 }
  0x36   : > { %s279_s11 = sshll.u32 %s271_s29, 4  ;;  %s277_s12 = sshll.u32 %s275_s16, 4  ;;  %s280_s11 = int_to_ptr.vmem [resolvable:$true] %s279_s11  ;;  %s278_s12 = int_to_ptr.hbm [resolvable:$true] %s277_s12 }
  0x37   : > { %s3609_s20 = sshra.s32 %s278_s12, 4  ;;  %s3616_s0 = scalar_lea.hbm %s4479_s4, 88  ;;  %s3610_s20 = int_to_ptr.hbm [resolvable:$true] %s3609_s20 }
  0x38   : > { %s3611_s13 = scalar_lea.hbm %s3610_s20, 44  ;;  %p3617_p7 = scmp.lt.s32.totalorder %s3610_s20, %s4479_s4 }
  0x39   : > { %p3612_p12 = scmp.ne.s32.totalorder %s3610_s20, %s3611_s13  ;;  %p3618_p6 = scmp.lt.s32.totalorder %s3616_s0, %s3611_s13 }
  0x3b   : > { %p3614_p0 = pnand %p3612_p12, %p3523_p2  ;;  %p3619_p8 = por %p3618_p6, %p3617_p7 }
  0x3d   : > { %p3615_p3 = pneg %p3614_p0 }
  0x3f   : > { %p3620_p9 = pnand %p3619_p8, %p3615_p3 }
  0x41   : > { %3623 = shalt.err (!%p3620_p9)
}
  0x42   : > { %3424 = dma.hbm_to_vmem [thread:$0]  (!%p3791_p13), %s278_s12, 704, %s280_s11, %s3802_s14  }
  0x43   : > { %288 = sbr.rel (%p3760_p5) target bundleno = 545 (0x221), region = 40 }
  0x48   : > { %3656 = dma.done.wait (%p106_p1), [#allocation3], 128  }
  0x49   : > { %3658 = vsyncadd (%p106_p1), [#allocation3], 4294967168 }
  0x4a   : > { %3660 = dma.done.wait (%p106_p1), [#allocation5], 528  }
  0x4b   : > { %3662 = vsyncadd (%p106_p1), [#allocation5], 4294966768  ;;  %s305_s3 = sand.u32 1, %s3745_s25   ;;  %s307_s19 = sand.u32 1, %s3673_s22  }
  0x4c   : > { %s3390_s30 = smul.u32 1408, %s307_s19  ;;  %s306_s14 = scalar_lea.sflag [#allocation8], %s305_s3 }
  0x4e   : > { %s3857_s1 = scalar_lea.vmem [#allocation7], %s3390_s30 }
  0x4f   : > { %3664 = dma.done.wait (%p3753_p4), %s306_s14, 23232  }
  0x50   : > { %3666 = vsyncadd (%p3753_p4), %s306_s14, 4294944064  ;;  %v378_v0 = vld [vmem:[#allocation4 + $0x18] sm:$0xff]  ;;  %v377_v1 = vld [vmem:[#allocation4 + $0x10] sm:$0xff]  ;;  %vm383_vm0 = vcmask 261120   ;;  %vm1565_vm1 = vcmask 523264   ;;  %s361_s26 = smul.u32 40, %s3745_s25 }
  0x51   : > { %399 = vmatpush.msra.mxu0 %v378_v0  ;;  %v376_v2 = vld [vmem:[#allocation4 + $0x8] sm:$0xff]  ;;  %v2986_v3 = vld [vmem:[%s3857_s1 + $0x420] sm:$0xf]  ;;  %v3366_v5 = vld [vmem:[%s3857_s1 + $0x4cc] sm:$0xf0]  ;;  %s4221_s21 = smul.u32 44, %s307_s19 }
  0x52   : > { %v375_v4 = vld [vmem:[#allocation4] sm:$0xff]  ;;  %v2988_v7 = vld [vmem:[%s3857_s1 + $0x4d0] sm:$0xf0]  ;;  %v2987_v9 = vor.u32 %v3366_v5, %v2986_v3  ;;  %v2994_v11 = vld [vmem:[%s3857_s1 + $0x428] sm:$0xf]  ;;  %p4241_p1 = scmp.lt.s32.totalorder %s361_s26, 79 }
  0x53   : > { %v3344_v6 = vld [vmem:[%s3857_s1 + $0x424] sm:$0xf]  ;;  %400 = vmatpush.msra.mxu0 %v377_v1  ;;  %v374_v8 = vld [vmem:[#allocation2] sm:$0xff]  ;;  %v3345_v13 = vld [vmem:[%s3857_s1 + $0x42c] sm:$0xf]  ;;  %s4260_s28 = scalar_lea.vmem [#allocation9], %s4221_s21 }
  0x54   : > { %v2991_v10 = vor.u32 %v3344_v6, %v2988_v7  ;;  %v3367_v12 = vld [vmem:[%s3857_s1 + $0x4d4] sm:$0xf0]  ;;  %v2996_v15 = vld [vmem:[%s3857_s1 + $0x4d8] sm:$0xf0]  ;;  %v2810_v16 = vld [vmem:[%s3857_s1 + $0x2c0] sm:$0xf]  ;;  %1573 = vmatpush.bf16.msra.mxu1 %v2987_v9 }
  0x55   : > { %v2995_v14 = vor.u32 %v3367_v12, %v2994_v11  ;;  %v3322_v17 = vld [vmem:[%s3857_s1 + $0x36c] sm:$0xf0]  ;;  %401 = vmatpush.msra.mxu0 %v376_v2  ;;  %v2999_v18 = vor.u32 %v3345_v13, %v2996_v15  ;;  %v3300_v20 = vld [vmem:[%s3857_s1 + $0x2c4] sm:$0xf]  ;;  %v2812_v21 = vld [vmem:[%s3857_s1 + $0x370] sm:$0xf0] }
  0x56   : > { %v2811_v19 = vor.u32 %v3322_v17, %v2810_v16  ;;  %v2818_v22 = vld [vmem:[%s3857_s1 + $0x2c8] sm:$0xf]  ;;  %1586 = vmatpush.bf16.msra.mxu2 %v2991_v10  ;;  %v2815_v23 = vor.u32 %v3300_v20, %v2812_v21  ;;  %v3323_v24 = vld [vmem:[%s3857_s1 + $0x374] sm:$0xf0]  ;;  %v3301_v25 = vld [vmem:[%s3857_s1 + $0x2cc] sm:$0xf] }
  0x57   : > { %1599 = vmatpush.bf16.msra.mxu3 %v2995_v14  ;;  %v2820_v26 = vld [vmem:[%s3857_s1 + $0x378] sm:$0xf0]  ;;  %402 = vmatpush.msra.mxu0 %v375_v4  ;;  %v2819_v27 = vor.u32 %v3323_v24, %v2818_v22  ;;  %v2634_v29 = vld [vmem:[%s3857_s1 + $0x160] sm:$0xf]  ;;  %v3278_v30 = vld [vmem:[%s3857_s1 + $0x20c] sm:$0xf0] }
  0x58   : > { %2455 = vmatmul.msk.f32.vlgmr.msra.gmra.mxu0 %vm383_vm0, %v374_v8  ;;  %1574 = vmatpush.bf16.msra.mxu1 %v2811_v19  ;;  %v2823_v28 = vor.u32 %v3301_v25, %v2820_v26  ;;  %v3256_v31 = vld [vmem:[%s3857_s1 + $0x164] sm:$0xf]  ;;  %v2635_v32 = vor.u32 %v3278_v30, %v2634_v29  ;;  %v2636_v33 = vld [vmem:[%s3857_s1 + $0x210] sm:$0xf0]  ;;  %v2642_v34 = vld [vmem:[%s3857_s1 + $0x168] sm:$0xf] }
  0x59   : > { %1612 = vmatpush.bf16.msrb.mxu0 %v2999_v18  ;;  %v3279_v35 = vld [vmem:[%s3857_s1 + $0x214] sm:$0xf0]  ;;  %v2639_v36 = vor.u32 %v3256_v31, %v2636_v33  ;;  %v3257_v38 = vld [vmem:[%s3857_s1 + $0x16c] sm:$0xf]  ;;  %v2644_v39 = vld [vmem:[%s3857_s1 + $0x218] sm:$0xf0] }
  0x5a   : > { %1587 = vmatpush.bf16.msra.mxu2 %v2815_v23  ;;  %v2643_v37 = vor.u32 %v3279_v35, %v2642_v34  ;;  %v2647_v40 = vor.u32 %v3257_v38, %v2644_v39  ;;  %v2458_v41 = vld [vmem:[%s3857_s1] sm:$0xf]  ;;  %v3234_v42 = vld [vmem:[%s3857_s1 + $0xac] sm:$0xf0]  ;;  %v3212_v43 = vld [vmem:[%s3857_s1 + $0x4] sm:$0xf] }
  0x5b   : > { %1600 = vmatpush.bf16.msra.mxu3 %v2819_v27  ;;  %v2459_v44 = vor.u32 %v3234_v42, %v2458_v41  ;;  %v2460_v45 = vld [vmem:[%s3857_s1 + $0xb0] sm:$0xf0]  ;;  %v2466_v46 = vld [vmem:[%s3857_s1 + $0x8] sm:$0xf]  ;;  %v3235_v47 = vld [vmem:[%s3857_s1 + $0xb4] sm:$0xf0] }
  0x5c   : > { %1575 = vmatpush.bf16.msra.mxu1 %v2635_v32  ;;  %v2463_v48 = vor.u32 %v3212_v43, %v2460_v45  ;;  %v2467_v49 = vor.u32 %v3235_v47, %v2466_v46  ;;  %v3213_v50 = vld [vmem:[%s3857_s1 + $0xc] sm:$0xf]  ;;  %v2468_v51 = vld [vmem:[%s3857_s1 + $0xb8] sm:$0xf0]  ;;  %v3346_v53 = vld [vmem:[%s3857_s1 + $0x434] sm:$0xf] }
  0x5d   : > { %1613 = vmatpush.bf16.msrb.mxu0 %v2823_v28  ;;  %v2471_v52 = vor.u32 %v3213_v50, %v2468_v51  ;;  %v3004_v54 = vld [vmem:[%s3857_s1 + $0x4e0] sm:$0xf0]  ;;  %v3002_v55 = vld [vmem:[%s3857_s1 + $0x430] sm:$0xf]  ;;  %v3368_v57 = vld [vmem:[%s3857_s1 + $0x4dc] sm:$0xf0] }
  0x5e   : > { %1588 = vmatpush.bf16.msra.mxu2 %v2639_v36  ;;  %v3007_v56 = vor.u32 %v3346_v53, %v3004_v54  ;;  %v3010_v58 = vld [vmem:[%s3857_s1 + $0x438] sm:$0xf]  ;;  %v3369_v59 = vld [vmem:[%s3857_s1 + $0x4e4] sm:$0xf0]  ;;  %v3003_v60 = vor.u32 %v3368_v57, %v3002_v55  ;;  %v3347_v62 = vld [vmem:[%s3857_s1 + $0x43c] sm:$0xf] }
  0x5f   : > { %1601 = vmatpush.bf16.msra.mxu3 %v2643_v37  ;;  %v3011_v61 = vor.u32 %v3369_v59, %v3010_v58  ;;  %v3012_v63 = vld [vmem:[%s3857_s1 + $0x4e8] sm:$0xf0]  ;;  %v3302_v0 = vld [vmem:[%s3857_s1 + $0x2d4] sm:$0xf]  ;;  %v2828_v2 = vld [vmem:[%s3857_s1 + $0x380] sm:$0xf0] }
  0x60   : > { %1576 = vmatpush.bf16.msra.mxu1 %v2459_v44  ;;  %v3015_v1 = vor.u32 %v3347_v62, %v3012_v63  ;;  %v2826_v3 = vld [vmem:[%s3857_s1 + $0x2d0] sm:$0xf]  ;;  %v3324_v4 = vld [vmem:[%s3857_s1 + $0x37c] sm:$0xf0]  ;;  %v2831_v5 = vor.u32 %v3302_v0, %v2828_v2  ;;  %v2834_v7 = vld [vmem:[%s3857_s1 + $0x2d8] sm:$0xf] }
  0x61   : > { %1614 = vmatpush.bf16.msrb.mxu0 %v2647_v40  ;;  %v2827_v6 = vor.u32 %v3324_v4, %v2826_v3  ;;  %v3325_v8 = vld [vmem:[%s3857_s1 + $0x384] sm:$0xf0]  ;;  %v3303_v9 = vld [vmem:[%s3857_s1 + $0x2dc] sm:$0xf]  ;;  %v2836_v11 = vld [vmem:[%s3857_s1 + $0x388] sm:$0xf0] }
  0x62   : > { %1589 = vmatpush.bf16.msra.mxu2 %v2463_v48  ;;  %v2835_v10 = vor.u32 %v3325_v8, %v2834_v7  ;;  %v3258_v12 = vld [vmem:[%s3857_s1 + $0x174] sm:$0xf]  ;;  %v2652_v13 = vld [vmem:[%s3857_s1 + $0x220] sm:$0xf0]  ;;  %v2839_v14 = vor.u32 %v3303_v9, %v2836_v11  ;;  %v2650_v15 = vld [vmem:[%s3857_s1 + $0x170] sm:$0xf] }
  0x63   : > { %1602 = vmatpush.bf16.msra.mxu3 %v2467_v49  ;;  %v3280_v16 = vld [vmem:[%s3857_s1 + $0x21c] sm:$0xf0]  ;;  %v2658_v17 = vld [vmem:[%s3857_s1 + $0x178] sm:$0xf]  ;;  %v2655_v18 = vor.u32 %v3258_v12, %v2652_v13  ;;  %v3281_v19 = vld [vmem:[%s3857_s1 + $0x224] sm:$0xf0] }
  0x64   : > { %1625 = vmatpush.bf16.msrb.mxu1 %v3003_v60  ;;  %v3259_v20 = vld [vmem:[%s3857_s1 + $0x17c] sm:$0xf]  ;;  %v2660_v21 = vld [vmem:[%s3857_s1 + $0x228] sm:$0xf0]  ;;  %v2651_v22 = vor.u32 %v3280_v16, %v2650_v15  ;;  %v2659_v23 = vor.u32 %v3281_v19, %v2658_v17  ;;  %v3214_v24 = vld [vmem:[%s3857_s1 + $0x14] sm:$0xf] }
  0x65   : > { %1615 = vmatpush.bf16.msrb.mxu0 %v2471_v52  ;;  %v2476_v25 = vld [vmem:[%s3857_s1 + $0xc0] sm:$0xf0]  ;;  %v2474_v26 = vld [vmem:[%s3857_s1 + $0x10] sm:$0xf]  ;;  %v2663_v27 = vor.u32 %v3259_v20, %v2660_v21  ;;  %v3236_v28 = vld [vmem:[%s3857_s1 + $0xbc] sm:$0xf0] }
  0x66   : > { %1638 = vmatpush.bf16.msrb.mxu2 %v3007_v56  ;;  %v2482_v29 = vld [vmem:[%s3857_s1 + $0x18] sm:$0xf]  ;;  %v3237_v30 = vld [vmem:[%s3857_s1 + $0xc4] sm:$0xf0]  ;;  %v3215_v31 = vld [vmem:[%s3857_s1 + $0x1c] sm:$0xf]  ;;  %v2479_v33 = vor.u32 %v3214_v24, %v2476_v25  ;;  %v2475_v34 = vor.u32 %v3236_v28, %v2474_v26 }
  0x67   : > { %1651 = vmatpush.bf16.msrb.mxu3 %v3011_v61  ;;  %v2484_v32 = vld [vmem:[%s3857_s1 + $0xc8] sm:$0xf0]  ;;  %v2483_v35 = vor.u32 %v3237_v30, %v2482_v29  ;;  %v3472_v37 = vld [vmem:[#allocation6] ss:$0 sm:$0xff]  ;;  %v3348_v40 = vld [vmem:[%s3857_s1 + $0x444] sm:$0xf] }
  0x68   : > { %1626 = vmatpush.bf16.msrb.mxu1 %v2827_v6  ;;  %v2487_v36 = vor.u32 %v3215_v31, %v2484_v32  ;;  %v3020_v41 = vld [vmem:[%s3857_s1 + $0x4f0] sm:$0xf0]  ;;  %v3018_v42 = vld [vmem:[%s3857_s1 + $0x440] sm:$0xf]  ;;  %v3370_v43 = vld [vmem:[%s3857_s1 + $0x4ec] sm:$0xf0] }
  0x69   : > { %1664 = vmatpush.bf16.msra.mxu0 %v3015_v1  ;;  %v3026_v44 = vld [vmem:[%s3857_s1 + $0x448] sm:$0xf]  ;;  %v3371_v45 = vld [vmem:[%s3857_s1 + $0x4f4] sm:$0xf0]  ;;  %v3349_v47 = vld [vmem:[%s3857_s1 + $0x44c] sm:$0xf]  ;;  %v3023_v50 = vor.u32 %v3348_v40, %v3020_v41  ;;  %v3019_v51 = vor.u32 %v3370_v43, %v3018_v42 }
  0x6a   : > { %1639 = vmatpush.bf16.msrb.mxu2 %v2831_v5  ;;  %v3028_v48 = vld [vmem:[%s3857_s1 + $0x4f8] sm:$0xf0]  ;;  %v3304_v52 = vld [vmem:[%s3857_s1 + $0x2e4] sm:$0xf]  ;;  %v2844_v53 = vld [vmem:[%s3857_s1 + $0x390] sm:$0xf0]  ;;  %v3027_v54 = vor.u32 %v3371_v45, %v3026_v44 }
  0x6b   : > { %1652 = vmatpush.bf16.msrb.mxu3 %v2835_v10  ;;  %v3031_v55 = vor.u32 %v3349_v47, %v3028_v48  ;;  %v2842_v56 = vld [vmem:[%s3857_s1 + $0x2e0] sm:$0xf]  ;;  %v3326_v57 = vld [vmem:[%s3857_s1 + $0x38c] sm:$0xf0]  ;;  %v2850_v58 = vld [vmem:[%s3857_s1 + $0x2e8] sm:$0xf]  ;;  %v2847_v62 = vor.u32 %v3304_v52, %v2844_v53 }
  0x6c   : > { %1627 = vmatpush.bf16.msrb.mxu1 %v2651_v22  ;;  %v3327_v59 = vld [vmem:[%s3857_s1 + $0x394] sm:$0xf0]  ;;  %v3305_v60 = vld [vmem:[%s3857_s1 + $0x2ec] sm:$0xf]  ;;  %v2852_v61 = vld [vmem:[%s3857_s1 + $0x398] sm:$0xf0]  ;;  %v2843_v63 = vor.u32 %v3326_v57, %v2842_v56 }
  0x6d   : > { %1665 = vmatpush.bf16.msra.mxu0 %v2839_v14  ;;  %v3260_v0 = vld [vmem:[%s3857_s1 + $0x184] sm:$0xf]  ;;  %v2668_v1 = vld [vmem:[%s3857_s1 + $0x230] sm:$0xf0]  ;;  %v2851_v2 = vor.u32 %v3327_v59, %v2850_v58  ;;  %v2855_v3 = vor.u32 %v3305_v60, %v2852_v61  ;;  %v2666_v4 = vld [vmem:[%s3857_s1 + $0x180] sm:$0xf] }
  0x6e   : > { %1640 = vmatpush.bf16.msrb.mxu2 %v2655_v18  ;;  %v3282_v5 = vld [vmem:[%s3857_s1 + $0x22c] sm:$0xf0]  ;;  %v2674_v6 = vld [vmem:[%s3857_s1 + $0x188] sm:$0xf]  ;;  %v3283_v7 = vld [vmem:[%s3857_s1 + $0x234] sm:$0xf0]  ;;  %v2671_v10 = vor.u32 %v3260_v0, %v2668_v1 }
  0x6f   : > { %1653 = vmatpush.bf16.msrb.mxu3 %v2659_v23  ;;  %v3261_v8 = vld [vmem:[%s3857_s1 + $0x18c] sm:$0xf]  ;;  %v2676_v9 = vld [vmem:[%s3857_s1 + $0x238] sm:$0xf0]  ;;  %v2667_v11 = vor.u32 %v3282_v5, %v2666_v4  ;;  %v3216_v12 = vld [vmem:[%s3857_s1 + $0x24] sm:$0xf]  ;;  %v2675_v14 = vor.u32 %v3283_v7, %v2674_v6 }
  0x70   : > { %1628 = vmatpush.bf16.msrb.mxu1 %v2475_v34  ;;  %v2492_v13 = vld [vmem:[%s3857_s1 + $0xd0] sm:$0xf0]  ;;  %v2679_v15 = vor.u32 %v3261_v8, %v2676_v9  ;;  %v2490_v16 = vld [vmem:[%s3857_s1 + $0x20] sm:$0xf]  ;;  %v3238_v17 = vld [vmem:[%s3857_s1 + $0xcc] sm:$0xf0] }
  0x71   : > { %1666 = vmatpush.bf16.msra.mxu0 %v2663_v27  ;;  %v2498_v18 = vld [vmem:[%s3857_s1 + $0x28] sm:$0xf]  ;;  %v3239_v19 = vld [vmem:[%s3857_s1 + $0xd4] sm:$0xf0]  ;;  %v3217_v20 = vld [vmem:[%s3857_s1 + $0x2c] sm:$0xf]  ;;  %v2495_v22 = vor.u32 %v3216_v12, %v2492_v13  ;;  %v2491_v23 = vor.u32 %v3238_v17, %v2490_v16 }
  0x72   : > { %1641 = vmatpush.bf16.msrb.mxu2 %v2479_v33  ;;  %v2500_v21 = vld [vmem:[%s3857_s1 + $0xd8] sm:$0xf0]  ;;  %v3350_v24 = vld [vmem:[%s3857_s1 + $0x454] sm:$0xf]  ;;  %v3036_v25 = vld [vmem:[%s3857_s1 + $0x500] sm:$0xf0]  ;;  %v2499_v26 = vor.u32 %v3239_v19, %v2498_v18 }
  0x73   : > { %1654 = vmatpush.bf16.msrb.mxu3 %v2483_v35  ;;  %v2503_v27 = vor.u32 %v3217_v20, %v2500_v21  ;;  %v3034_v28 = vld [vmem:[%s3857_s1 + $0x450] sm:$0xf]  ;;  %v3372_v29 = vld [vmem:[%s3857_s1 + $0x4fc] sm:$0xf0]  ;;  %v3042_v30 = vld [vmem:[%s3857_s1 + $0x458] sm:$0xf]  ;;  %v3039_v34 = vor.u32 %v3350_v24, %v3036_v25 }
  0x74   : > { %v3373_v31 = vld [vmem:[%s3857_s1 + $0x504] sm:$0xf0]  ;;  %v3351_v32 = vld [vmem:[%s3857_s1 + $0x45c] sm:$0xf]  ;;  %v3044_v33 = vld [vmem:[%s3857_s1 + $0x508] sm:$0xf0]  ;;  %v3035_v35 = vor.u32 %v3372_v29, %v3034_v28 }
  0x75   : > { %1667 = vmatpush.bf16.msra.mxu0 %v2487_v36  ;;  %v3306_v36 = vld [vmem:[%s3857_s1 + $0x2f4] sm:$0xf]  ;;  %v2858_v40 = vld [vmem:[%s3857_s1 + $0x2f0] sm:$0xf]  ;;  %v3328_v41 = vld [vmem:[%s3857_s1 + $0x39c] sm:$0xf0] }
  0x76   : > { %v2866_v42 = vld [vmem:[%s3857_s1 + $0x2f8] sm:$0xf]  ;;  %v3329_v43 = vld [vmem:[%s3857_s1 + $0x3a4] sm:$0xf0]  ;;  %v3307_v44 = vld [vmem:[%s3857_s1 + $0x2fc] sm:$0xf]  ;;  %v2859_v47 = vor.u32 %v3328_v41, %v2858_v40 }
  0x77   : > { %v2868_v45 = vld [vmem:[%s3857_s1 + $0x3a8] sm:$0xf0]  ;;  %v3262_v48 = vld [vmem:[%s3857_s1 + $0x194] sm:$0xf]  ;;  %v2682_v53 = vld [vmem:[%s3857_s1 + $0x190] sm:$0xf] }
  0x78   : > { %v2871_v52 = vor.u32 %v3307_v44, %v2868_v45  ;;  %v3285_v56 = vld [vmem:[%s3857_s1 + $0x244] sm:$0xf0]  ;;  %v3263_v57 = vld [vmem:[%s3857_s1 + $0x19c] sm:$0xf]  ;;  %v2692_v58 = vld [vmem:[%s3857_s1 + $0x248] sm:$0xf0] }
  0x79   : > { %v3218_v61 = vld [vmem:[%s3857_s1 + $0x34] sm:$0xf]  ;;  %v2695_v0 = vor.u32 %v3263_v57, %v2692_v58  ;;  %v2506_v1 = vld [vmem:[%s3857_s1 + $0x30] sm:$0xf]  ;;  %v3241_v4 = vld [vmem:[%s3857_s1 + $0xe4] sm:$0xf0] }
  0x7a   : > { %v3219_v5 = vld [vmem:[%s3857_s1 + $0x3c] sm:$0xf]  ;;  %v2516_v6 = vld [vmem:[%s3857_s1 + $0xe8] sm:$0xf0]  ;;  %v3352_v9 = vld [vmem:[%s3857_s1 + $0x464] sm:$0xf] }
  0x7b   : > { %v2519_v12 = vor.u32 %v3219_v5, %v2516_v6  ;;  %v3050_v13 = vld [vmem:[%s3857_s1 + $0x460] sm:$0xf]  ;;  %v3375_v16 = vld [vmem:[%s3857_s1 + $0x514] sm:$0xf0]  ;;  %v3353_v17 = vld [vmem:[%s3857_s1 + $0x46c] sm:$0xf] }
  0x7c   : > { %v3060_v18 = vld [vmem:[%s3857_s1 + $0x518] sm:$0xf0]  ;;  %v3308_v21 = vld [vmem:[%s3857_s1 + $0x304] sm:$0xf]  ;;  %v2874_v25 = vld [vmem:[%s3857_s1 + $0x300] sm:$0xf] }
  0x7d   : > { %v3063_v24 = vor.u32 %v3353_v17, %v3060_v18  ;;  %v3331_v28 = vld [vmem:[%s3857_s1 + $0x3b4] sm:$0xf0]  ;;  %v3309_v29 = vld [vmem:[%s3857_s1 + $0x30c] sm:$0xf]  ;;  %v3220_v45 = vld [vmem:[%s3857_s1 + $0x44] sm:$0xf] }
  0x7e   : > { %v3287_v40 = vld [vmem:[%s3857_s1 + $0x254] sm:$0xf0]  ;;  %v3265_v41 = vld [vmem:[%s3857_s1 + $0x1ac] sm:$0xf]  ;;  %v3354_v58 = vld [vmem:[%s3857_s1 + $0x474] sm:$0xf] }
  0x7f   : > { %v3310_v6 = vld [vmem:[%s3857_s1 + $0x314] sm:$0xf]  ;;  %s4510_s26 = smov (!%p4241_p1, %s361_s26), 79  ;;  %s3204_s11 = sshll.u32 %s3745_s25, 9 }
  0x80   : > { %v3266_v18 = vld [vmem:[%s3857_s1 + $0x1b4] sm:$0xf]  ;;  %s2452_s7 = sshll.u32 %s4510_s26, 3  ;;  %s2453_s12 = sshll.u32 %s3745_s25, 2 }
  0x81   : > { %s4287_s29 = scalar_lea.vmem %s4480_s5, %s2452_s7  ;;  %p368_p4 = scmp.lt.s32.totalorder %s2453_s12, 7 }
  0x83   : > { %s4512_s12 = smov (!%p368_p4, %s2453_s12), 7 }
  0x84   : > { %s2454_s25 = sshll.u32 %s4512_s12, 3 }
  0x85   : > { %s4423_s24 = scalar_lea.vmem %s4481_s6, %s2454_s25 }
  0xd5   : > { %v404_v38 = vpop.f32.mrf.mxu0 }
  0xd6   : > { %v405_v39 = vadd.f32 %v3472_v37, %v404_v38  ;;  %v2860_v37 = vld [vmem:[%s3857_s1 + $0x3a0] sm:$0xf0]  ;;  %v3043_v38 = vor.u32 %v3373_v31, %v3042_v30  ;;  %v2884_v30 = vld [vmem:[%s3857_s1 + $0x3b8] sm:$0xf0] }
  0xd8   : > { %v407_v46 = vmax.f32 %v405_v39, 0.0  ;;  %v3047_v39 = vor.u32 %v3351_v32, %v3044_v33  ;;  %v3264_v33 = vld [vmem:[%s3857_s1 + $0x1a4] sm:$0xf] }
  0xda   : > { %v3936_v49 = vpack.c.bf16 %v407_v46, %v407_v46  ;;  %v2863_v46 = vor.u32 %v3306_v36, %v2860_v37  ;;  %v2887_v36 = vor.u32 %v3309_v29, %v2884_v30  ;;  %v2698_v37 = vld [vmem:[%s3857_s1 + $0x1a0] sm:$0xf]  ;;  %v3222_v30 = vld [vmem:[%s3857_s1 + $0x54] sm:$0xf] }
  0xdc   : > { %3160 = vmatmul.msk.bf16.vlgmr.msra.gmra.mxu1 %vm1565_vm1, %v3936_v49  ;;  %3161 = vmatmul.msk.bf16.vlgmr.msra.gmra.mxu2 %vm1565_vm1, %v3936_v49 }
  0xdd   : > { %3162 = vmatmul.msk.bf16.vlgmr.msra.gmra.mxu3 %vm1565_vm1, %v3936_v49  ;;  %3163 = vmatmul.msk.bf16.vlgmr.msrb.gmra.mxu0 %vm1565_vm1, %v3936_v49 }
  0xde   : > { %1690 = vmatpush.bf16.msra.mxu2 %v3023_v50  ;;  %1677 = vmatpush.bf16.msra.mxu1 %v3019_v51  ;;  %v2684_v50 = vld [vmem:[%s3857_s1 + $0x240] sm:$0xf0]  ;;  %v2867_v51 = vor.u32 %v3329_v43, %v2866_v42  ;;  %v2708_v42 = vld [vmem:[%s3857_s1 + $0x258] sm:$0xf0] }
  0xdf   : > { %1703 = vmatpush.bf16.msra.mxu3 %v3027_v54  ;;  %1716 = vmatpush.bf16.msrb.mxu0 %v3031_v55  ;;  %v3284_v54 = vld [vmem:[%s3857_s1 + $0x23c] sm:$0xf0]  ;;  %v2690_v55 = vld [vmem:[%s3857_s1 + $0x198] sm:$0xf]  ;;  %v2687_v59 = vor.u32 %v3262_v48, %v2684_v50  ;;  %v2711_v48 = vor.u32 %v3265_v41, %v2708_v42  ;;  %v3356_v42 = vld [vmem:[%s3857_s1 + $0x484] sm:$0xf] }
  0xe0   : > { %v2683_v60 = vor.u32 %v3284_v54, %v2682_v53  ;;  %v2522_v50 = vld [vmem:[%s3857_s1 + $0x40] sm:$0xf]  ;;  %v3243_v53 = vld [vmem:[%s3857_s1 + $0xf4] sm:$0xf0]  ;;  %v3221_v54 = vld [vmem:[%s3857_s1 + $0x4c] sm:$0xf] }
  0xe2   : > { %1691 = vmatpush.bf16.msra.mxu2 %v2847_v62  ;;  %1678 = vmatpush.bf16.msra.mxu1 %v2843_v63  ;;  %v2508_v62 = vld [vmem:[%s3857_s1 + $0xe0] sm:$0xf0]  ;;  %v2691_v63 = vor.u32 %v3285_v56, %v2690_v55  ;;  %v2532_v55 = vld [vmem:[%s3857_s1 + $0xf8] sm:$0xf0] }
  0xe3   : > { %1704 = vmatpush.bf16.msra.mxu3 %v2851_v2  ;;  %1717 = vmatpush.bf16.msrb.mxu0 %v2855_v3  ;;  %v3240_v2 = vld [vmem:[%s3857_s1 + $0xdc] sm:$0xf0]  ;;  %v2514_v3 = vld [vmem:[%s3857_s1 + $0x38] sm:$0xf]  ;;  %v2511_v7 = vor.u32 %v3218_v61, %v2508_v62  ;;  %v2535_v61 = vor.u32 %v3221_v54, %v2532_v55  ;;  %v3066_v62 = vld [vmem:[%s3857_s1 + $0x470] sm:$0xf] }
  0xe4   : > { %v2507_v8 = vor.u32 %v3240_v2, %v2506_v1  ;;  %v3377_v1 = vld [vmem:[%s3857_s1 + $0x524] sm:$0xf0]  ;;  %v3355_v2 = vld [vmem:[%s3857_s1 + $0x47c] sm:$0xf]  ;;  %v3312_v55 = vld [vmem:[%s3857_s1 + $0x324] sm:$0xf] }
  0xe6   : > { %1692 = vmatpush.bf16.msra.mxu2 %v2671_v10  ;;  %1679 = vmatpush.bf16.msra.mxu1 %v2667_v11  ;;  %v3052_v10 = vld [vmem:[%s3857_s1 + $0x510] sm:$0xf0]  ;;  %v2515_v11 = vor.u32 %v3241_v4, %v2514_v3  ;;  %v3076_v3 = vld [vmem:[%s3857_s1 + $0x528] sm:$0xf0] }
  0xe7   : > { %1705 = vmatpush.bf16.msra.mxu3 %v2675_v14  ;;  %1718 = vmatpush.bf16.msrb.mxu0 %v2679_v15  ;;  %v3374_v14 = vld [vmem:[%s3857_s1 + $0x50c] sm:$0xf0]  ;;  %v3058_v15 = vld [vmem:[%s3857_s1 + $0x468] sm:$0xf]  ;;  %v3055_v19 = vor.u32 %v3352_v9, %v3052_v10  ;;  %v3079_v9 = vor.u32 %v3355_v2, %v3076_v3  ;;  %v3268_v3 = vld [vmem:[%s3857_s1 + $0x1c4] sm:$0xf] }
  0xe8   : > { %v3051_v20 = vor.u32 %v3374_v14, %v3050_v13  ;;  %v2890_v10 = vld [vmem:[%s3857_s1 + $0x310] sm:$0xf]  ;;  %v3333_v13 = vld [vmem:[%s3857_s1 + $0x3c4] sm:$0xf0]  ;;  %v3311_v14 = vld [vmem:[%s3857_s1 + $0x31c] sm:$0xf] }
  0xea   : > { %1693 = vmatpush.bf16.msra.mxu2 %v2495_v22  ;;  %1680 = vmatpush.bf16.msra.mxu1 %v2491_v23  ;;  %v2876_v22 = vld [vmem:[%s3857_s1 + $0x3b0] sm:$0xf0]  ;;  %v3059_v23 = vor.u32 %v3375_v16, %v3058_v15  ;;  %v2900_v15 = vld [vmem:[%s3857_s1 + $0x3c8] sm:$0xf0] }
  0xeb   : > { %1706 = vmatpush.bf16.msra.mxu3 %v2499_v26  ;;  %1719 = vmatpush.bf16.msrb.mxu0 %v2503_v27  ;;  %v3330_v26 = vld [vmem:[%s3857_s1 + $0x3ac] sm:$0xf0]  ;;  %v2882_v27 = vld [vmem:[%s3857_s1 + $0x308] sm:$0xf]  ;;  %v2879_v31 = vor.u32 %v3308_v21, %v2876_v22  ;;  %v2903_v21 = vor.u32 %v3311_v14, %v2900_v15  ;;  %v3224_v15 = vld [vmem:[%s3857_s1 + $0x64] sm:$0xf] }
  0xec   : > { %3164 = vmatmul.msk.bf16.vlgmr.msrb.gmra.mxu1 %vm1565_vm1, %v3936_v49  ;;  %3165 = vmatmul.msk.bf16.vlgmr.msrb.gmra.mxu2 %vm1565_vm1, %v3936_v49  ;;  %v2875_v32 = vor.u32 %v3330_v26, %v2874_v25  ;;  %v2714_v22 = vld [vmem:[%s3857_s1 + $0x1b0] sm:$0xf]  ;;  %v3289_v25 = vld [vmem:[%s3857_s1 + $0x264] sm:$0xf0]  ;;  %v3267_v26 = vld [vmem:[%s3857_s1 + $0x1bc] sm:$0xf] }
  0xed   : > { %3166 = vmatmul.msk.bf16.vlgmr.msrb.gmra.mxu3 %vm1565_vm1, %v3936_v49  ;;  %3167 = vmatmul.msk.bf16.vlgmr.msra.gmra.mxu0 %vm1565_vm1, %v3936_v49 }
  0xee   : > { %1742 = vmatpush.bf16.msrb.mxu2 %v3039_v34  ;;  %1729 = vmatpush.bf16.msrb.mxu1 %v3035_v35  ;;  %v2700_v34 = vld [vmem:[%s3857_s1 + $0x250] sm:$0xf0]  ;;  %v2883_v35 = vor.u32 %v3331_v28, %v2882_v27  ;;  %v2724_v27 = vld [vmem:[%s3857_s1 + $0x268] sm:$0xf0] }
  0xef   : > { %1755 = vmatpush.bf16.msrb.mxu3 %v3043_v38  ;;  %1768 = vmatpush.bf16.msra.mxu0 %v3047_v39  ;;  %v3286_v38 = vld [vmem:[%s3857_s1 + $0x24c] sm:$0xf0]  ;;  %v2706_v39 = vld [vmem:[%s3857_s1 + $0x1a8] sm:$0xf]  ;;  %v2703_v43 = vor.u32 %v3264_v33, %v2700_v34  ;;  %v2727_v33 = vor.u32 %v3267_v26, %v2724_v27  ;;  %v3358_v27 = vld [vmem:[%s3857_s1 + $0x494] sm:$0xf] }
  0xf0   : > { %v2699_v44 = vor.u32 %v3286_v38, %v2698_v37  ;;  %v2538_v34 = vld [vmem:[%s3857_s1 + $0x50] sm:$0xf]  ;;  %v3245_v37 = vld [vmem:[%s3857_s1 + $0x104] sm:$0xf0]  ;;  %v3223_v38 = vld [vmem:[%s3857_s1 + $0x5c] sm:$0xf] }
  0xf2   : > { %1743 = vmatpush.bf16.msrb.mxu2 %v2863_v46  ;;  %1730 = vmatpush.bf16.msrb.mxu1 %v2859_v47  ;;  %v2524_v46 = vld [vmem:[%s3857_s1 + $0xf0] sm:$0xf0]  ;;  %v2707_v47 = vor.u32 %v3287_v40, %v2706_v39  ;;  %v2548_v39 = vld [vmem:[%s3857_s1 + $0x108] sm:$0xf0] }
  0xf3   : > { %1756 = vmatpush.bf16.msrb.mxu3 %v2867_v51  ;;  %1769 = vmatpush.bf16.msra.mxu0 %v2871_v52  ;;  %v3242_v51 = vld [vmem:[%s3857_s1 + $0xec] sm:$0xf0]  ;;  %v2530_v52 = vld [vmem:[%s3857_s1 + $0x48] sm:$0xf]  ;;  %v2527_v56 = vor.u32 %v3220_v45, %v2524_v46  ;;  %v2551_v45 = vor.u32 %v3223_v38, %v2548_v39  ;;  %v3082_v46 = vld [vmem:[%s3857_s1 + $0x480] sm:$0xf] }
  0xf4   : > { %v2523_v57 = vor.u32 %v3242_v51, %v2522_v50  ;;  %v3379_v50 = vld [vmem:[%s3857_s1 + $0x534] sm:$0xf0]  ;;  %v3357_v51 = vld [vmem:[%s3857_s1 + $0x48c] sm:$0xf]  ;;  %v3314_v39 = vld [vmem:[%s3857_s1 + $0x334] sm:$0xf] }
  0xf6   : > { %1744 = vmatpush.bf16.msrb.mxu2 %v2687_v59  ;;  %1731 = vmatpush.bf16.msrb.mxu1 %v2683_v60  ;;  %v3068_v59 = vld [vmem:[%s3857_s1 + $0x520] sm:$0xf0]  ;;  %v2531_v60 = vor.u32 %v3243_v53, %v2530_v52  ;;  %v3092_v52 = vld [vmem:[%s3857_s1 + $0x538] sm:$0xf0] }
  0xf7   : > { %1757 = vmatpush.bf16.msrb.mxu3 %v2691_v63  ;;  %1770 = vmatpush.bf16.msra.mxu0 %v2695_v0  ;;  %v3376_v63 = vld [vmem:[%s3857_s1 + $0x51c] sm:$0xf0]  ;;  %v3074_v0 = vld [vmem:[%s3857_s1 + $0x478] sm:$0xf]  ;;  %v3071_v4 = vor.u32 %v3354_v58, %v3068_v59  ;;  %v3095_v58 = vor.u32 %v3357_v51, %v3092_v52  ;;  %v3270_v52 = vld [vmem:[%s3857_s1 + $0x1d4] sm:$0xf] }
  0xf8   : > { %v3067_v5 = vor.u32 %v3376_v63, %v3066_v62  ;;  %v2906_v59 = vld [vmem:[%s3857_s1 + $0x320] sm:$0xf]  ;;  %v3335_v62 = vld [vmem:[%s3857_s1 + $0x3d4] sm:$0xf0]  ;;  %v3313_v63 = vld [vmem:[%s3857_s1 + $0x32c] sm:$0xf] }
  0xfa   : > { %1745 = vmatpush.bf16.msrb.mxu2 %v2511_v7  ;;  %1732 = vmatpush.bf16.msrb.mxu1 %v2507_v8  ;;  %v2892_v7 = vld [vmem:[%s3857_s1 + $0x3c0] sm:$0xf0]  ;;  %v3075_v8 = vor.u32 %v3377_v1, %v3074_v0  ;;  %v2916_v0 = vld [vmem:[%s3857_s1 + $0x3d8] sm:$0xf0] }
  0xfb   : > { %1758 = vmatpush.bf16.msrb.mxu3 %v2515_v11  ;;  %1771 = vmatpush.bf16.msra.mxu0 %v2519_v12  ;;  %v3332_v11 = vld [vmem:[%s3857_s1 + $0x3bc] sm:$0xf0]  ;;  %v2898_v12 = vld [vmem:[%s3857_s1 + $0x318] sm:$0xf]  ;;  %v2895_v16 = vor.u32 %v3310_v6, %v2892_v7  ;;  %v2919_v6 = vor.u32 %v3313_v63, %v2916_v0  ;;  %v3226_v0 = vld [vmem:[%s3857_s1 + $0x74] sm:$0xf] }
  0xfc   : > { %3168 = vmatmul.msk.bf16.vlgmr.msra.gmra.mxu1 %vm1565_vm1, %v3936_v49  ;;  %3169 = vmatmul.msk.bf16.vlgmr.msra.gmra.mxu2 %vm1565_vm1, %v3936_v49  ;;  %v2891_v17 = vor.u32 %v3332_v11, %v2890_v10  ;;  %v2730_v7 = vld [vmem:[%s3857_s1 + $0x1c0] sm:$0xf]  ;;  %v3291_v10 = vld [vmem:[%s3857_s1 + $0x274] sm:$0xf0]  ;;  %v3269_v11 = vld [vmem:[%s3857_s1 + $0x1cc] sm:$0xf] }
  0xfd   : > { %3170 = vmatmul.msk.bf16.vlgmr.msra.gmra.mxu3 %vm1565_vm1, %v3936_v49  ;;  %3171 = vmatmul.msk.bf16.vlgmr.msrb.gmra.mxu0 %vm1565_vm1, %v3936_v49 }
  0xfe   : > { %1794 = vmatpush.bf16.msra.mxu2 %v3055_v19  ;;  %1781 = vmatpush.bf16.msra.mxu1 %v3051_v20  ;;  %v2716_v19 = vld [vmem:[%s3857_s1 + $0x260] sm:$0xf0]  ;;  %v2899_v20 = vor.u32 %v3333_v13, %v2898_v12  ;;  %v2740_v12 = vld [vmem:[%s3857_s1 + $0x278] sm:$0xf0] }
  0xff   : > { %1807 = vmatpush.bf16.msra.mxu3 %v3059_v23  ;;  %1820 = vmatpush.bf16.msrb.mxu0 %v3063_v24  ;;  %v3288_v23 = vld [vmem:[%s3857_s1 + $0x25c] sm:$0xf0]  ;;  %v2722_v24 = vld [vmem:[%s3857_s1 + $0x1b8] sm:$0xf]  ;;  %v2719_v28 = vor.u32 %v3266_v18, %v2716_v19  ;;  %v2743_v18 = vor.u32 %v3269_v11, %v2740_v12  ;;  %v3360_v12 = vld [vmem:[%s3857_s1 + $0x4a4] sm:$0xf] }
 0x100   : > { %v2715_v29 = vor.u32 %v3288_v23, %v2714_v22  ;;  %v2554_v19 = vld [vmem:[%s3857_s1 + $0x60] sm:$0xf]  ;;  %v3247_v22 = vld [vmem:[%s3857_s1 + $0x114] sm:$0xf0]  ;;  %v3225_v23 = vld [vmem:[%s3857_s1 + $0x6c] sm:$0xf] }
 0x102   : > { %1795 = vmatpush.bf16.msra.mxu2 %v2879_v31  ;;  %1782 = vmatpush.bf16.msra.mxu1 %v2875_v32  ;;  %v2540_v31 = vld [vmem:[%s3857_s1 + $0x100] sm:$0xf0]  ;;  %v2723_v32 = vor.u32 %v3289_v25, %v2722_v24  ;;  %v2564_v24 = vld [vmem:[%s3857_s1 + $0x118] sm:$0xf0] }
 0x103   : > { %1808 = vmatpush.bf16.msra.mxu3 %v2883_v35  ;;  %1821 = vmatpush.bf16.msrb.mxu0 %v2887_v36  ;;  %v3244_v35 = vld [vmem:[%s3857_s1 + $0xfc] sm:$0xf0]  ;;  %v2546_v36 = vld [vmem:[%s3857_s1 + $0x58] sm:$0xf]  ;;  %v2543_v40 = vor.u32 %v3222_v30, %v2540_v31  ;;  %v2567_v30 = vor.u32 %v3225_v23, %v2564_v24  ;;  %v3098_v31 = vld [vmem:[%s3857_s1 + $0x490] sm:$0xf] }
 0x104   : > { %v2539_v41 = vor.u32 %v3244_v35, %v2538_v34  ;;  %v3381_v34 = vld [vmem:[%s3857_s1 + $0x544] sm:$0xf0]  ;;  %v3359_v35 = vld [vmem:[%s3857_s1 + $0x49c] sm:$0xf]  ;;  %v3316_v24 = vld [vmem:[%s3857_s1 + $0x344] sm:$0xf] }
 0x106   : > { %1796 = vmatpush.bf16.msra.mxu2 %v2703_v43  ;;  %1783 = vmatpush.bf16.msra.mxu1 %v2699_v44  ;;  %v3084_v43 = vld [vmem:[%s3857_s1 + $0x530] sm:$0xf0]  ;;  %v2547_v44 = vor.u32 %v3245_v37, %v2546_v36  ;;  %v3108_v36 = vld [vmem:[%s3857_s1 + $0x548] sm:$0xf0] }
 0x107   : > { %1809 = vmatpush.bf16.msra.mxu3 %v2707_v47  ;;  %1822 = vmatpush.bf16.msrb.mxu0 %v2711_v48  ;;  %v3378_v47 = vld [vmem:[%s3857_s1 + $0x52c] sm:$0xf0]  ;;  %v3090_v48 = vld [vmem:[%s3857_s1 + $0x488] sm:$0xf]  ;;  %v3087_v53 = vor.u32 %v3356_v42, %v3084_v43  ;;  %v3111_v42 = vor.u32 %v3359_v35, %v3108_v36  ;;  %v3272_v36 = vld [vmem:[%s3857_s1 + $0x1e4] sm:$0xf] }
 0x108   : > { %v3083_v54 = vor.u32 %v3378_v47, %v3082_v46  ;;  %v2922_v43 = vld [vmem:[%s3857_s1 + $0x330] sm:$0xf]  ;;  %v3337_v46 = vld [vmem:[%s3857_s1 + $0x3e4] sm:$0xf0]  ;;  %v3315_v47 = vld [vmem:[%s3857_s1 + $0x33c] sm:$0xf] }
 0x10a   : > { %1797 = vmatpush.bf16.msra.mxu2 %v2527_v56  ;;  %1784 = vmatpush.bf16.msra.mxu1 %v2523_v57  ;;  %v2908_v56 = vld [vmem:[%s3857_s1 + $0x3d0] sm:$0xf0]  ;;  %v3091_v57 = vor.u32 %v3379_v50, %v3090_v48  ;;  %v2932_v48 = vld [vmem:[%s3857_s1 + $0x3e8] sm:$0xf0] }
 0x10b   : > { %1810 = vmatpush.bf16.msra.mxu3 %v2531_v60  ;;  %1823 = vmatpush.bf16.msrb.mxu0 %v2535_v61  ;;  %v3334_v60 = vld [vmem:[%s3857_s1 + $0x3cc] sm:$0xf0]  ;;  %v2914_v61 = vld [vmem:[%s3857_s1 + $0x328] sm:$0xf]  ;;  %v2911_v1 = vor.u32 %v3312_v55, %v2908_v56  ;;  %v2935_v55 = vor.u32 %v3315_v47, %v2932_v48  ;;  %v3228_v48 = vld [vmem:[%s3857_s1 + $0x84] sm:$0xf] }
 0x10c   : > { %3172 = vmatmul.msk.bf16.vlgmr.msrb.gmra.mxu1 %vm1565_vm1, %v3936_v49  ;;  %3173 = vmatmul.msk.bf16.vlgmr.msrb.gmra.mxu2 %vm1565_vm1, %v3936_v49  ;;  %v2907_v2 = vor.u32 %v3334_v60, %v2906_v59  ;;  %v2746_v56 = vld [vmem:[%s3857_s1 + $0x1d0] sm:$0xf]  ;;  %v3293_v59 = vld [vmem:[%s3857_s1 + $0x284] sm:$0xf0]  ;;  %v3271_v60 = vld [vmem:[%s3857_s1 + $0x1dc] sm:$0xf] }
 0x10d   : > { %3174 = vmatmul.msk.bf16.vlgmr.msrb.gmra.mxu3 %vm1565_vm1, %v3936_v49  ;;  %3175 = vmatmul.msk.bf16.vlgmr.msra.gmra.mxu0 %vm1565_vm1, %v3936_v49 }
 0x10e   : > { %1846 = vmatpush.bf16.msrb.mxu2 %v3071_v4  ;;  %1833 = vmatpush.bf16.msrb.mxu1 %v3067_v5  ;;  %v2732_v4 = vld [vmem:[%s3857_s1 + $0x270] sm:$0xf0]  ;;  %v2915_v5 = vor.u32 %v3335_v62, %v2914_v61  ;;  %v2756_v61 = vld [vmem:[%s3857_s1 + $0x288] sm:$0xf0] }
 0x10f   : > { %1859 = vmatpush.bf16.msrb.mxu3 %v3075_v8  ;;  %1872 = vmatpush.bf16.msra.mxu0 %v3079_v9  ;;  %v3290_v8 = vld [vmem:[%s3857_s1 + $0x26c] sm:$0xf0]  ;;  %v2738_v9 = vld [vmem:[%s3857_s1 + $0x1c8] sm:$0xf]  ;;  %v2735_v13 = vor.u32 %v3268_v3, %v2732_v4  ;;  %v2759_v3 = vor.u32 %v3271_v60, %v2756_v61  ;;  %v3362_v61 = vld [vmem:[%s3857_s1 + $0x4b4] sm:$0xf] }
 0x110   : > { %v2731_v14 = vor.u32 %v3290_v8, %v2730_v7  ;;  %v2570_v4 = vld [vmem:[%s3857_s1 + $0x70] sm:$0xf]  ;;  %v3249_v7 = vld [vmem:[%s3857_s1 + $0x124] sm:$0xf0]  ;;  %v3227_v8 = vld [vmem:[%s3857_s1 + $0x7c] sm:$0xf] }
 0x112   : > { %1847 = vmatpush.bf16.msrb.mxu2 %v2895_v16  ;;  %1834 = vmatpush.bf16.msrb.mxu1 %v2891_v17  ;;  %v2556_v16 = vld [vmem:[%s3857_s1 + $0x110] sm:$0xf0]  ;;  %v2739_v17 = vor.u32 %v3291_v10, %v2738_v9  ;;  %v2580_v9 = vld [vmem:[%s3857_s1 + $0x128] sm:$0xf0] }
 0x113   : > { %1860 = vmatpush.bf16.msrb.mxu3 %v2899_v20  ;;  %1873 = vmatpush.bf16.msra.mxu0 %v2903_v21  ;;  %v3246_v20 = vld [vmem:[%s3857_s1 + $0x10c] sm:$0xf0]  ;;  %v2562_v21 = vld [vmem:[%s3857_s1 + $0x68] sm:$0xf]  ;;  %v2559_v25 = vor.u32 %v3224_v15, %v2556_v16  ;;  %v2583_v15 = vor.u32 %v3227_v8, %v2580_v9  ;;  %v3114_v16 = vld [vmem:[%s3857_s1 + $0x4a0] sm:$0xf] }
 0x114   : > { %v2555_v26 = vor.u32 %v3246_v20, %v2554_v19  ;;  %v3383_v19 = vld [vmem:[%s3857_s1 + $0x554] sm:$0xf0]  ;;  %v3361_v20 = vld [vmem:[%s3857_s1 + $0x4ac] sm:$0xf]  ;;  %v3318_v9 = vld [vmem:[%s3857_s1 + $0x354] sm:$0xf] }
 0x116   : > { %1848 = vmatpush.bf16.msrb.mxu2 %v2719_v28  ;;  %1835 = vmatpush.bf16.msrb.mxu1 %v2715_v29  ;;  %v3100_v28 = vld [vmem:[%s3857_s1 + $0x540] sm:$0xf0]  ;;  %v2563_v29 = vor.u32 %v3247_v22, %v2562_v21  ;;  %v3124_v21 = vld [vmem:[%s3857_s1 + $0x558] sm:$0xf0] }
 0x117   : > { %1861 = vmatpush.bf16.msrb.mxu3 %v2723_v32  ;;  %1874 = vmatpush.bf16.msra.mxu0 %v2727_v33  ;;  %v3380_v32 = vld [vmem:[%s3857_s1 + $0x53c] sm:$0xf0]  ;;  %v3106_v33 = vld [vmem:[%s3857_s1 + $0x498] sm:$0xf]  ;;  %v3103_v37 = vor.u32 %v3358_v27, %v3100_v28  ;;  %v3127_v27 = vor.u32 %v3361_v20, %v3124_v21  ;;  %v3274_v21 = vld [vmem:[%s3857_s1 + $0x1f4] sm:$0xf] }
 0x118   : > { %v3099_v38 = vor.u32 %v3380_v32, %v3098_v31  ;;  %v2938_v28 = vld [vmem:[%s3857_s1 + $0x340] sm:$0xf]  ;;  %v3339_v31 = vld [vmem:[%s3857_s1 + $0x3f4] sm:$0xf0]  ;;  %v3317_v32 = vld [vmem:[%s3857_s1 + $0x34c] sm:$0xf] }
 0x11a   : > { %1849 = vmatpush.bf16.msrb.mxu2 %v2543_v40  ;;  %1836 = vmatpush.bf16.msrb.mxu1 %v2539_v41  ;;  %v2924_v40 = vld [vmem:[%s3857_s1 + $0x3e0] sm:$0xf0]  ;;  %v3107_v41 = vor.u32 %v3381_v34, %v3106_v33  ;;  %v2948_v33 = vld [vmem:[%s3857_s1 + $0x3f8] sm:$0xf0] }
 0x11b   : > { %1862 = vmatpush.bf16.msrb.mxu3 %v2547_v44  ;;  %1875 = vmatpush.bf16.msra.mxu0 %v2551_v45  ;;  %v3336_v44 = vld [vmem:[%s3857_s1 + $0x3dc] sm:$0xf0]  ;;  %v2930_v45 = vld [vmem:[%s3857_s1 + $0x338] sm:$0xf]  ;;  %v2927_v50 = vor.u32 %v3314_v39, %v2924_v40  ;;  %v2951_v39 = vor.u32 %v3317_v32, %v2948_v33 }
 0x11c   : > { %3176 = vmatmul.msk.bf16.vlgmr.msra.gmra.mxu1 %vm1565_vm1, %v3936_v49  ;;  %3177 = vmatmul.msk.bf16.vlgmr.msra.gmra.mxu2 %vm1565_vm1, %v3936_v49  ;;  %v2923_v51 = vor.u32 %v3336_v44, %v2922_v43  ;;  %v2762_v40 = vld [vmem:[%s3857_s1 + $0x1e0] sm:$0xf]  ;;  %v3295_v43 = vld [vmem:[%s3857_s1 + $0x294] sm:$0xf0]  ;;  %v3273_v44 = vld [vmem:[%s3857_s1 + $0x1ec] sm:$0xf] }
 0x11d   : > { %3178 = vmatmul.msk.bf16.vlgmr.msra.gmra.mxu3 %vm1565_vm1, %v3936_v49  ;;  %3179 = vmatmul.msk.bf16.vlgmr.msrb.gmra.mxu0 %vm1565_vm1, %v3936_v49 }
 0x11e   : > { %1898 = vmatpush.bf16.msra.mxu2 %v3087_v53  ;;  %1885 = vmatpush.bf16.msra.mxu1 %v3083_v54  ;;  %v2748_v53 = vld [vmem:[%s3857_s1 + $0x280] sm:$0xf0]  ;;  %v2931_v54 = vor.u32 %v3337_v46, %v2930_v45  ;;  %v2772_v45 = vld [vmem:[%s3857_s1 + $0x298] sm:$0xf0] }
 0x11f   : > { %1911 = vmatpush.bf16.msra.mxu3 %v3091_v57  ;;  %1924 = vmatpush.bf16.msrb.mxu0 %v3095_v58  ;;  %v3292_v57 = vld [vmem:[%s3857_s1 + $0x27c] sm:$0xf0]  ;;  %v2754_v58 = vld [vmem:[%s3857_s1 + $0x1d8] sm:$0xf]  ;;  %v2751_v62 = vor.u32 %v3270_v52, %v2748_v53  ;;  %v2775_v52 = vor.u32 %v3273_v44, %v2772_v45 }
 0x120   : > { %v2747_v63 = vor.u32 %v3292_v57, %v2746_v56  ;;  %v2586_v53 = vld [vmem:[%s3857_s1 + $0x80] sm:$0xf]  ;;  %v3251_v56 = vld [vmem:[%s3857_s1 + $0x134] sm:$0xf0]  ;;  %v3229_v57 = vld [vmem:[%s3857_s1 + $0x8c] sm:$0xf] }
 0x122   : > { %1899 = vmatpush.bf16.msra.mxu2 %v2911_v1  ;;  %1886 = vmatpush.bf16.msra.mxu1 %v2907_v2  ;;  %v2572_v1 = vld [vmem:[%s3857_s1 + $0x120] sm:$0xf0]  ;;  %v2755_v2 = vor.u32 %v3293_v59, %v2754_v58  ;;  %v2596_v58 = vld [vmem:[%s3857_s1 + $0x138] sm:$0xf0] }
 0x123   : > { %1912 = vmatpush.bf16.msra.mxu3 %v2915_v5  ;;  %1925 = vmatpush.bf16.msrb.mxu0 %v2919_v6  ;;  %v3248_v5 = vld [vmem:[%s3857_s1 + $0x11c] sm:$0xf0]  ;;  %v2578_v6 = vld [vmem:[%s3857_s1 + $0x78] sm:$0xf]  ;;  %v2575_v10 = vor.u32 %v3226_v0, %v2572_v1  ;;  %v2599_v0 = vor.u32 %v3229_v57, %v2596_v58  ;;  %v3130_v1 = vld [vmem:[%s3857_s1 + $0x4b0] sm:$0xf] }
 0x124   : > { %v2571_v11 = vor.u32 %v3248_v5, %v2570_v4  ;;  %v3385_v4 = vld [vmem:[%s3857_s1 + $0x564] sm:$0xf0]  ;;  %v3363_v5 = vld [vmem:[%s3857_s1 + $0x4bc] sm:$0xf]  ;;  %v3365_v57 = vld [vmem:[%s3857_s1 + $0x4cc] sm:$0xf] }
 0x125   : > { %v3156_v58 = vld [vmem:[%s3857_s1 + $0x578] sm:$0xf0] }
 0x126   : > { %1900 = vmatpush.bf16.msra.mxu2 %v2735_v13  ;;  %1887 = vmatpush.bf16.msra.mxu1 %v2731_v14  ;;  %v3116_v13 = vld [vmem:[%s3857_s1 + $0x550] sm:$0xf0]  ;;  %v2579_v14 = vor.u32 %v3249_v7, %v2578_v6  ;;  %v3140_v6 = vld [vmem:[%s3857_s1 + $0x568] sm:$0xf0] }
 0x127   : > { %1913 = vmatpush.bf16.msra.mxu3 %v2739_v17  ;;  %1926 = vmatpush.bf16.msrb.mxu0 %v2743_v18  ;;  %v3382_v17 = vld [vmem:[%s3857_s1 + $0x54c] sm:$0xf0]  ;;  %v3122_v18 = vld [vmem:[%s3857_s1 + $0x4a8] sm:$0xf]  ;;  %v3119_v22 = vor.u32 %v3360_v12, %v3116_v13  ;;  %v3143_v12 = vor.u32 %v3363_v5, %v3140_v6  ;;  %v3159_v5 = vor.u32 %v3365_v57, %v3156_v58  ;;  %v2970_v6 = vld [vmem:[%s3857_s1 + $0x360] sm:$0xf] }
 0x128   : > { %v3115_v23 = vor.u32 %v3382_v17, %v3114_v16  ;;  %v2954_v13 = vld [vmem:[%s3857_s1 + $0x350] sm:$0xf]  ;;  %v3341_v16 = vld [vmem:[%s3857_s1 + $0x404] sm:$0xf0]  ;;  %v3319_v17 = vld [vmem:[%s3857_s1 + $0x35c] sm:$0xf] }
 0x12a   : > { %1901 = vmatpush.bf16.msra.mxu2 %v2559_v25  ;;  %1888 = vmatpush.bf16.msra.mxu1 %v2555_v26  ;;  %v2940_v25 = vld [vmem:[%s3857_s1 + $0x3f0] sm:$0xf0]  ;;  %v3123_v26 = vor.u32 %v3383_v19, %v3122_v18  ;;  %v2964_v18 = vld [vmem:[%s3857_s1 + $0x408] sm:$0xf0] }
 0x12b   : > { %1914 = vmatpush.bf16.msra.mxu3 %v2563_v29  ;;  %1927 = vmatpush.bf16.msrb.mxu0 %v2567_v30  ;;  %v3338_v29 = vld [vmem:[%s3857_s1 + $0x3ec] sm:$0xf0]  ;;  %v2946_v30 = vld [vmem:[%s3857_s1 + $0x348] sm:$0xf]  ;;  %v2943_v34 = vor.u32 %v3316_v24, %v2940_v25  ;;  %v2967_v24 = vor.u32 %v3319_v17, %v2964_v18 }
 0x12c   : > { %3180 = vmatmul.msk.bf16.vlgmr.msrb.gmra.mxu1 %vm1565_vm1, %v3936_v49  ;;  %3181 = vmatmul.msk.bf16.vlgmr.msrb.gmra.mxu2 %vm1565_vm1, %v3936_v49  ;;  %v2939_v35 = vor.u32 %v3338_v29, %v2938_v28  ;;  %v2778_v25 = vld [vmem:[%s3857_s1 + $0x1f0] sm:$0xf]  ;;  %v3297_v28 = vld [vmem:[%s3857_s1 + $0x2a4] sm:$0xf0]  ;;  %v3275_v29 = vld [vmem:[%s3857_s1 + $0x1fc] sm:$0xf] }
 0x12d   : > { %3182 = vmatmul.msk.bf16.vlgmr.msrb.gmra.mxu3 %vm1565_vm1, %v3936_v49  ;;  %3183 = vmatmul.msk.bf16.vlgmr.msra.gmra.mxu0 %vm1565_vm1, %v3936_v49 }
 0x12e   : > { %1950 = vmatpush.bf16.msrb.mxu2 %v3103_v37  ;;  %1937 = vmatpush.bf16.msrb.mxu1 %v3099_v38  ;;  %v2764_v37 = vld [vmem:[%s3857_s1 + $0x290] sm:$0xf0]  ;;  %v2947_v38 = vor.u32 %v3339_v31, %v2946_v30  ;;  %v2788_v30 = vld [vmem:[%s3857_s1 + $0x2a8] sm:$0xf0] }
 0x12f   : > { %1963 = vmatpush.bf16.msrb.mxu3 %v3107_v41  ;;  %1976 = vmatpush.bf16.msra.mxu0 %v3111_v42  ;;  %v3294_v41 = vld [vmem:[%s3857_s1 + $0x28c] sm:$0xf0]  ;;  %v2770_v42 = vld [vmem:[%s3857_s1 + $0x1e8] sm:$0xf]  ;;  %v2767_v46 = vor.u32 %v3272_v36, %v2764_v37  ;;  %v2791_v37 = vor.u32 %v3275_v29, %v2788_v30  ;;  %v3232_v30 = vld [vmem:[%s3857_s1 + $0xa4] sm:$0xf] }
 0x130   : > { %v2763_v47 = vor.u32 %v3294_v41, %v2762_v40  ;;  %v4263_v31 = vld [vmem:[%s4260_s28] sm:$0xff]  ;;  %v2610_v40 = vld [vmem:[%s3857_s1 + $0x98] sm:$0xf]  ;;  %v3253_v41 = vld [vmem:[%s3857_s1 + $0x144] sm:$0xf0] }
 0x131   : > { %v597_v44 = vperm.slane %v4263_v31, 0  ;;  %v600_v45 = vperm.slane %v4263_v31, 3  ;;  %v602_v57 = vperm.slane %v4263_v31, 5  ;;  %v603_v58 = vperm.slane %v4263_v31, 6 }
 0x132   : > { %1951 = vmatpush.bf16.msrb.mxu2 %v2927_v50  ;;  %1938 = vmatpush.bf16.msrb.mxu1 %v2923_v51  ;;  %v2588_v50 = vld [vmem:[%s3857_s1 + $0x130] sm:$0xf0]  ;;  %v2771_v51 = vor.u32 %v3295_v43, %v2770_v42  ;;  %v3231_v42 = vld [vmem:[%s3857_s1 + $0x9c] sm:$0xf]  ;;  %v2612_v43 = vld [vmem:[%s3857_s1 + $0x148] sm:$0xf0] }
 0x133   : > { %1964 = vmatpush.bf16.msrb.mxu3 %v2931_v54  ;;  %1977 = vmatpush.bf16.msra.mxu0 %v2935_v55  ;;  %v3250_v54 = vld [vmem:[%s3857_s1 + $0x12c] sm:$0xf0]  ;;  %v2594_v55 = vld [vmem:[%s3857_s1 + $0x88] sm:$0xf]  ;;  %v2591_v59 = vor.u32 %v3228_v48, %v2588_v50  ;;  %v3364_v48 = vld [vmem:[%s3857_s1 + $0x4c4] sm:$0xf] }
 0x134   : > { %v2587_v60 = vor.u32 %v3250_v54, %v2586_v53  ;;  %v3148_v50 = vld [vmem:[%s3857_s1 + $0x570] sm:$0xf0]  ;;  %v3146_v53 = vld [vmem:[%s3857_s1 + $0x4c0] sm:$0xf]  ;;  %v3386_v54 = vld [vmem:[%s3857_s1 + $0x56c] sm:$0xf0] }
 0x136   : > { %1952 = vmatpush.bf16.msrb.mxu2 %v2751_v62  ;;  %1939 = vmatpush.bf16.msrb.mxu1 %v2747_v63  ;;  %v3132_v62 = vld [vmem:[%s3857_s1 + $0x560] sm:$0xf0]  ;;  %v2595_v63 = vor.u32 %v3251_v56, %v2594_v55  ;;  %v3154_v55 = vld [vmem:[%s3857_s1 + $0x4c8] sm:$0xf]  ;;  %v3387_v56 = vld [vmem:[%s3857_s1 + $0x574] sm:$0xf0] }
 0x137   : > { %1965 = vmatpush.bf16.msrb.mxu3 %v2755_v2  ;;  %1978 = vmatpush.bf16.msra.mxu0 %v2759_v3  ;;  %v3384_v2 = vld [vmem:[%s3857_s1 + $0x55c] sm:$0xf0]  ;;  %v3138_v3 = vld [vmem:[%s3857_s1 + $0x4b8] sm:$0xf]  ;;  %v3135_v7 = vor.u32 %v3362_v61, %v3132_v62  ;;  %v598_v62 = vperm.slane %v4263_v31, 1 }
 0x138   : > { %v3131_v8 = vor.u32 %v3384_v2, %v3130_v1  ;;  %v3320_v1 = vld [vmem:[%s3857_s1 + $0x364] sm:$0xf]  ;;  %v2972_v2 = vld [vmem:[%s3857_s1 + $0x410] sm:$0xf0] }
 0x13a   : > { %1953 = vmatpush.bf16.msrb.mxu2 %v2575_v10  ;;  %1940 = vmatpush.bf16.msrb.mxu1 %v2571_v11  ;;  %v2956_v10 = vld [vmem:[%s3857_s1 + $0x400] sm:$0xf0]  ;;  %v3139_v11 = vor.u32 %v3385_v4, %v3138_v3  ;;  %v3155_v4 = vor.u32 %v3387_v56, %v3154_v55 }
 0x13b   : > { %1966 = vmatpush.bf16.msrb.mxu3 %v2579_v14  ;;  %1979 = vmatpush.bf16.msra.mxu0 %v2583_v15  ;;  %v3340_v14 = vld [vmem:[%s3857_s1 + $0x3fc] sm:$0xf0]  ;;  %v2962_v15 = vld [vmem:[%s3857_s1 + $0x358] sm:$0xf]  ;;  %v2959_v19 = vor.u32 %v3318_v9, %v2956_v10  ;;  %v3321_v10 = vld [vmem:[%s3857_s1 + $0x36c] sm:$0xf] }
 0x13c   : > { %3184 = vmatmul.msk.bf16.vlgmr.msra.gmra.mxu1 %vm1565_vm1, %v3936_v49  ;;  %3185 = vmatmul.msk.bf16.vlgmr.msra.gmra.mxu2 %vm1565_vm1, %v3936_v49  ;;  %v2955_v20 = vor.u32 %v3340_v14, %v2954_v13  ;;  %v3343_v9 = vld [vmem:[%s3857_s1 + $0x414] sm:$0xf0]  ;;  %v2975_v13 = vor.u32 %v3320_v1, %v2972_v2 }
 0x13d   : > { %3186 = vmatmul.msk.bf16.vlgmr.msra.gmra.mxu3 %vm1565_vm1, %v3936_v49  ;;  %3187 = vmatmul.msk.bf16.vlgmr.msrb.gmra.mxu0 %vm1565_vm1, %v3936_v49  ;;  %v586_v1 = vld [vmem:[%s4260_s28 + $0x8] sm:$0xff] }
 0x13e   : > { %2002 = vmatpush.bf16.msra.mxu2 %v3119_v22  ;;  %1989 = vmatpush.bf16.msra.mxu1 %v3115_v23  ;;  %v2780_v22 = vld [vmem:[%s3857_s1 + $0x2a0] sm:$0xf0]  ;;  %v2963_v23 = vor.u32 %v3341_v16, %v2962_v15  ;;  %v2796_v16 = vld [vmem:[%s3857_s1 + $0x2b0] sm:$0xf0]  ;;  %v605_v2 = vperm.slane %v586_v1, 0 }
 0x13f   : > { %2015 = vmatpush.bf16.msra.mxu3 %v3123_v26  ;;  %2028 = vmatpush.bf16.msrb.mxu0 %v3127_v27  ;;  %v3296_v26 = vld [vmem:[%s3857_s1 + $0x29c] sm:$0xf0]  ;;  %v2786_v27 = vld [vmem:[%s3857_s1 + $0x1f8] sm:$0xf]  ;;  %v2783_v32 = vor.u32 %v3274_v21, %v2780_v22  ;;  %v3276_v15 = vld [vmem:[%s3857_s1 + $0x204] sm:$0xf] }
 0x140   : > { %v2779_v33 = vor.u32 %v3296_v26, %v2778_v25  ;;  %v2787_v36 = vor.u32 %v3297_v28, %v2786_v27  ;;  %v3298_v21 = vld [vmem:[%s3857_s1 + $0x2ac] sm:$0xf0]  ;;  %v2802_v22 = vld [vmem:[%s3857_s1 + $0x208] sm:$0xf]  ;;  %v3299_v25 = vld [vmem:[%s3857_s1 + $0x2b4] sm:$0xf0] }
 0x141   : > { %v3277_v26 = vld [vmem:[%s3857_s1 + $0x20c] sm:$0xf]  ;;  %v2804_v27 = vld [vmem:[%s3857_s1 + $0x2b8] sm:$0xf0] }
 0x142   : > { %2003 = vmatpush.bf16.msra.mxu2 %v2943_v34  ;;  %1990 = vmatpush.bf16.msra.mxu1 %v2939_v35  ;;  %v3230_v34 = vld [vmem:[%s3857_s1 + $0x94] sm:$0xf]  ;;  %v2604_v35 = vld [vmem:[%s3857_s1 + $0x140] sm:$0xf0] }
 0x143   : > { %2016 = vmatpush.bf16.msra.mxu3 %v2947_v38  ;;  %2029 = vmatpush.bf16.msrb.mxu0 %v2951_v39  ;;  %v2602_v38 = vld [vmem:[%s3857_s1 + $0x90] sm:$0xf]  ;;  %v3252_v39 = vld [vmem:[%s3857_s1 + $0x13c] sm:$0xf0] }
 0x146   : > { %2004 = vmatpush.bf16.msra.mxu2 %v2767_v46  ;;  %1991 = vmatpush.bf16.msra.mxu1 %v2763_v47  ;;  %v2607_v46 = vor.u32 %v3230_v34, %v2604_v35  ;;  %v2603_v47 = vor.u32 %v3252_v39, %v2602_v38  ;;  %v2620_v35 = vld [vmem:[%s3857_s1 + $0x150] sm:$0xf0]  ;;  %v2807_v38 = vor.u32 %v3277_v26, %v2804_v27  ;;  %v3254_v39 = vld [vmem:[%s3857_s1 + $0x14c] sm:$0xf0] }
 0x147   : > { %2017 = vmatpush.bf16.msra.mxu3 %v2771_v51  ;;  %2030 = vmatpush.bf16.msrb.mxu0 %v2775_v52  ;;  %v2611_v51 = vor.u32 %v3253_v41, %v2610_v40  ;;  %v2615_v52 = vor.u32 %v3231_v42, %v2612_v43  ;;  %v2626_v40 = vld [vmem:[%s3857_s1 + $0xa8] sm:$0xf]  ;;  %v3255_v41 = vld [vmem:[%s3857_s1 + $0x154] sm:$0xf0]  ;;  %v3233_v42 = vld [vmem:[%s3857_s1 + $0xac] sm:$0xf] }
 0x148   : > { %v2628_v43 = vld [vmem:[%s3857_s1 + $0x158] sm:$0xf0] }
 0x14a   : > { %2005 = vmatpush.bf16.msra.mxu2 %v2591_v59  ;;  %1992 = vmatpush.bf16.msra.mxu1 %v2587_v60 }
 0x14b   : > { %2018 = vmatpush.bf16.msra.mxu3 %v2595_v63  ;;  %2031 = vmatpush.bf16.msrb.mxu0 %v2599_v0  ;;  %v3151_v63 = vor.u32 %v3364_v48, %v3148_v50  ;;  %v3147_v0 = vor.u32 %v3386_v54, %v3146_v53  ;;  %v604_v48 = vperm.slane %v4263_v31, 7  ;;  %v2627_v50 = vor.u32 %v3255_v41, %v2626_v40 }
 0x14c   : > { %3188 = vmatmul.msk.bf16.vlgmr.msrb.gmra.mxu1 %vm1565_vm1, %v3936_v49  ;;  %3189 = vmatmul.msk.bf16.vlgmr.msrb.gmra.mxu2 %vm1565_vm1, %v3936_v49 }
 0x14d   : > { %3190 = vmatmul.msk.bf16.vlgmr.msrb.gmra.mxu3 %vm1565_vm1, %v3936_v49  ;;  %3191 = vmatmul.msk.bf16.vlgmr.msra.gmra.mxu0 %vm1565_vm1, %v3936_v49 }
 0x14e   : > { %2054 = vmatpush.bf16.msrb.mxu2 %v3135_v7  ;;  %2041 = vmatpush.bf16.msrb.mxu1 %v3131_v8  ;;  %v3342_v7 = vld [vmem:[%s3857_s1 + $0x40c] sm:$0xf0]  ;;  %v2978_v8 = vld [vmem:[%s3857_s1 + $0x368] sm:$0xf] }
 0x14f   : > { %2067 = vmatpush.bf16.msrb.mxu3 %v3139_v11  ;;  %2080 = vmatpush.bf16.msra.mxu0 %v3143_v12  ;;  %v2980_v11 = vld [vmem:[%s3857_s1 + $0x418] sm:$0xf0]  ;;  %v599_v12 = vperm.slane %v4263_v31, 2  ;;  %v2971_v14 = vor.u32 %v3342_v7, %v2970_v6  ;;  %v2979_v18 = vor.u32 %v3343_v9, %v2978_v8  ;;  %v606_v9 = vperm.slane %v586_v1, 1 }
 0x152   : > { %2055 = vmatpush.bf16.msrb.mxu2 %v2959_v19  ;;  %2042 = vmatpush.bf16.msrb.mxu1 %v2955_v20  ;;  %v2983_v19 = vor.u32 %v3321_v10, %v2980_v11  ;;  %v2794_v20 = vld [vmem:[%s3857_s1 + $0x200] sm:$0xf]  ;;  %v607_v10 = vperm.slane %v586_v1, 2 }
 0x153   : > { %2068 = vmatpush.bf16.msrb.mxu3 %v2963_v23  ;;  %2081 = vmatpush.bf16.msra.mxu0 %v2967_v24  ;;  %v2795_v34 = vor.u32 %v3298_v21, %v2794_v20 }
 0x156   : > { %2056 = vmatpush.bf16.msrb.mxu2 %v2783_v32  ;;  %2043 = vmatpush.bf16.msrb.mxu1 %v2779_v33  ;;  %v2799_v33 = vor.u32 %v3276_v15, %v2796_v16 }
 0x157   : > { %2069 = vmatpush.bf16.msrb.mxu3 %v2787_v36  ;;  %2082 = vmatpush.bf16.msra.mxu0 %v2791_v37  ;;  %v2618_v36 = vld [vmem:[%s3857_s1 + $0xa0] sm:$0xf]  ;;  %v2803_v37 = vor.u32 %v3299_v25, %v2802_v22  ;;  %v611_v25 = vperm.slane %v586_v1, 6 }
 0x159   : > { %v1578_v59 = vpop.f32.mrf.mxu1 }
 0x15a   : > { %v1579_v60 = vadd.f32 %v1578_v59, %v597_v44  ;;  %v1617_v61 = vpop.f32.mrf.mxu0  ;;  %2057 = vmatpush.bf16.msrb.mxu2 %v2607_v46  ;;  %2044 = vmatpush.bf16.msrb.mxu1 %v2603_v47  ;;  %v601_v44 = vperm.slane %v4263_v31, 4  ;;  %v2619_v46 = vor.u32 %v3254_v39, %v2618_v36 }
 0x15b   : > { %v1618_v3 = vadd.f32 %v1617_v61, %v600_v45  ;;  %2070 = vmatpush.bf16.msrb.mxu3 %v2611_v51  ;;  %2083 = vmatpush.bf16.msra.mxu0 %v2615_v52  ;;  %v2623_v45 = vor.u32 %v3232_v30, %v2620_v35  ;;  %v2631_v51 = vor.u32 %v3233_v42, %v2628_v43 }
 0x15c   : > { %2141 = vst [vmem:[%s4287_s29] sm:$0xff] %v1579_v60  ;;  %3192 = vmatmul.msk.bf16.vlgmr.msra.gmra.mxu1 %vm1565_vm1, %v3936_v49  ;;  %3193 = vmatmul.msk.bf16.vlgmr.msra.gmra.mxu2 %vm1565_vm1, %v3936_v49 }
 0x15d   : > { %2144 = vst [vmem:[%s4287_s29 + $0x18] sm:$0xff] %v1618_v3  ;;  %3194 = vmatmul.msk.bf16.vlgmr.msra.gmra.mxu3 %vm1565_vm1, %v3936_v49  ;;  %3195 = vmatmul.msk.bf16.vlgmr.msrb.gmra.mxu0 %vm1565_vm1, %v3936_v49 }
 0x15e   : > { %2106 = vmatpush.bf16.msra.mxu2 %v3151_v63  ;;  %2093 = vmatpush.bf16.msra.mxu1 %v3147_v0 }
 0x15f   : > { %v1591_v17 = vpop.f32.mrf.mxu2  ;;  %2119 = vmatpush.bf16.msra.mxu3 %v3155_v4  ;;  %2132 = vmatpush.bf16.msrb.mxu0 %v3159_v5  ;;  %v608_v4 = vperm.slane %v586_v1, 3 }
 0x160   : > { %v1592_v23 = vadd.f32 %v1591_v17, %v598_v62  ;;  %v1604_v24 = vpop.f32.mrf.mxu3  ;;  %v609_v17 = vperm.slane %v586_v1, 4 }
 0x161   : > { %v1605_v28 = vadd.f32 %v1604_v24, %v599_v12  ;;  %v1580_v29 = vpop.f32.mrf.mxu1  ;;  %v610_v24 = vperm.slane %v586_v1, 5 }
 0x162   : > { %2142 = vst [vmem:[%s4287_s29 + $0x8] sm:$0xff] %v1592_v23  ;;  %v1619_v32 = vpop.f32.mrf.mxu0  ;;  %2107 = vmatpush.bf16.msra.mxu2 %v2975_v13  ;;  %2094 = vmatpush.bf16.msra.mxu1 %v2971_v14 }
 0x163   : > { %2143 = vst [vmem:[%s4287_s29 + $0x10] sm:$0xff] %v1605_v28  ;;  %2120 = vmatpush.bf16.msra.mxu3 %v2979_v18  ;;  %2133 = vmatpush.bf16.msrb.mxu0 %v2983_v19  ;;  %v612_v19 = vperm.slane %v586_v1, 7 }
 0x166   : > { %2108 = vmatpush.bf16.msra.mxu2 %v2799_v33  ;;  %2095 = vmatpush.bf16.msra.mxu1 %v2795_v34  ;;  %v587_v33 = vld [vmem:[%s4260_s28 + $0x10] sm:$0xff] }
 0x167   : > { %v1593_v47 = vpop.f32.mrf.mxu2  ;;  %2121 = vmatpush.bf16.msra.mxu3 %v2803_v37  ;;  %2134 = vmatpush.bf16.msrb.mxu0 %v2807_v38  ;;  %v613_v34 = vperm.slane %v587_v33, 0  ;;  %v616_v36 = vperm.slane %v587_v33, 3  ;;  %v614_v42 = vperm.slane %v587_v33, 1  ;;  %v615_v43 = vperm.slane %v587_v33, 2 }
 0x168   : > { %v1606_v52 = vpop.f32.mrf.mxu3 }
 0x169   : > { %v1630_v53 = vpop.f32.mrf.mxu1 }
 0x16a   : > { %v1631_v54 = vadd.f32 %v1630_v53, %v601_v44  ;;  %v1669_v55 = vpop.f32.mrf.mxu0  ;;  %2109 = vmatpush.bf16.msra.mxu2 %v2623_v45  ;;  %2096 = vmatpush.bf16.msra.mxu1 %v2619_v46  ;;  %v620_v53 = vperm.slane %v587_v33, 7 }
 0x16b   : > { %v1670_v56 = vadd.f32 %v1669_v55, %v604_v48  ;;  %2122 = vmatpush.bf16.msra.mxu3 %v2627_v50  ;;  %2135 = vmatpush.bf16.msrb.mxu0 %v2631_v51  ;;  %v617_v51 = vperm.slane %v587_v33, 4 }
 0x16c   : > { %2145 = vst [vmem:[%s4287_s29 + $0x20] sm:$0xff] %v1631_v54  ;;  %3196 = vmatmul.msk.bf16.vlgmr.msrb.gmra.mxu1 %vm1565_vm1, %v3936_v49  ;;  %3197 = vmatmul.msk.bf16.vlgmr.msrb.gmra.mxu2 %vm1565_vm1, %v3936_v49 }
 0x16d   : > { %2148 = vst [vmem:[%s4287_s29 + $0x38] sm:$0xff] %v1670_v56  ;;  %3198 = vmatmul.msk.bf16.vlgmr.msrb.gmra.mxu3 %vm1565_vm1, %v3936_v49  ;;  %3199 = vmatmul.msk.bf16.vlgmr.msra.gmra.mxu0 %vm1565_vm1, %v3936_v49 }
 0x16f   : > { %v1643_v59 = vpop.f32.mrf.mxu2 }
 0x170   : > { %v1644_v60 = vadd.f32 %v1643_v59, %v602_v57  ;;  %v1656_v61 = vpop.f32.mrf.mxu3  ;;  %v618_v59 = vperm.slane %v587_v33, 5 }
 0x171   : > { %v1657_v62 = vadd.f32 %v1656_v61, %v603_v58  ;;  %v1632_v63 = vpop.f32.mrf.mxu1 }
 0x172   : > { %2146 = vst [vmem:[%s4287_s29 + $0x28] sm:$0xff] %v1644_v60  ;;  %v1671_v0 = vpop.f32.mrf.mxu0  ;;  %v619_v60 = vperm.slane %v587_v33, 6 }
 0x173   : > { %2147 = vst [vmem:[%s4287_s29 + $0x30] sm:$0xff] %v1657_v62 }
 0x177   : > { %v1645_v3 = vpop.f32.mrf.mxu2 }
 0x178   : > { %v1658_v5 = vpop.f32.mrf.mxu3  ;;  %v588_v3 = vld [vmem:[%s4260_s28 + $0x18] sm:$0xff] }
 0x179   : > { %v1682_v6 = vpop.f32.mrf.mxu1 }
 0x17a   : > { %v1683_v7 = vadd.f32 %v1682_v6, %v605_v2  ;;  %v1721_v8 = vpop.f32.mrf.mxu0  ;;  %v624_v6 = vperm.slane %v588_v3, 3 }
 0x17b   : > { %v1722_v31 = vadd.f32 %v1721_v8, %v608_v4  ;;  %v621_v4 = vperm.slane %v588_v3, 0 }
 0x17c   : > { %2149 = vst [vmem:[%s4287_s29 + $0x40] sm:$0xff] %v1683_v7  ;;  %3200 = vmatmul.msk.bf16.vlgmr.msra.gmra.mxu1 %vm1565_vm1, %v3936_v49  ;;  %3201 = vmatmul.msk.bf16.vlgmr.msra.gmra.mxu2 %vm1565_vm1, %v3936_v49 }
 0x17d   : > { %2152 = vst [vmem:[%s4287_s29 + $0x58] sm:$0xff] %v1722_v31  ;;  %3202 = vmatmul.msk.bf16.vlgmr.msra.gmra.mxu3 %vm1565_vm1, %v3936_v49  ;;  %3203 = vmatmul.msk.bf16.vlgmr.msrb.gmra.mxu0 %vm1565_vm1, %v3936_v49 }
 0x17f   : > { %v1695_v11 = vpop.f32.mrf.mxu2 }
 0x180   : > { %v1696_v12 = vadd.f32 %v1695_v11, %v606_v9  ;;  %v1708_v13 = vpop.f32.mrf.mxu3  ;;  %v622_v11 = vperm.slane %v588_v3, 1 }
 0x181   : > { %v1709_v14 = vadd.f32 %v1708_v13, %v607_v10  ;;  %v1684_v15 = vpop.f32.mrf.mxu1 }
 0x182   : > { %2150 = vst [vmem:[%s4287_s29 + $0x48] sm:$0xff] %v1696_v12  ;;  %v1723_v16 = vpop.f32.mrf.mxu0  ;;  %v623_v12 = vperm.slane %v588_v3, 2 }
 0x183   : > { %2151 = vst [vmem:[%s4287_s29 + $0x50] sm:$0xff] %v1709_v14 }
 0x187   : > { %v1697_v18 = vpop.f32.mrf.mxu2 }
 0x188   : > { %v1710_v20 = vpop.f32.mrf.mxu3 }
 0x189   : > { %v1734_v21 = vpop.f32.mrf.mxu1 }
 0x18a   : > { %v1735_v49 = vadd.f32 %v1734_v21, %v609_v17  ;;  %v1773_v22 = vpop.f32.mrf.mxu0  ;;  %v628_v21 = vperm.slane %v588_v3, 7 }
 0x18b   : > { %v1774_v23 = vadd.f32 %v1773_v22, %v612_v19  ;;  %v625_v19 = vperm.slane %v588_v3, 4 }
 0x18c   : > { %2153 = vst [vmem:[%s4287_s29 + $0x60] sm:$0xff] %v1735_v49 }
 0x18d   : > { %2156 = vst [vmem:[%s4287_s29 + $0x78] sm:$0xff] %v1774_v23 }
 0x18f   : > { %v1747_v26 = vpop.f32.mrf.mxu2 }
 0x190   : > { %v1748_v27 = vadd.f32 %v1747_v26, %v610_v24  ;;  %v1760_v28 = vpop.f32.mrf.mxu3  ;;  %v626_v26 = vperm.slane %v588_v3, 5 }
 0x191   : > { %v1761_v29 = vadd.f32 %v1760_v28, %v611_v25  ;;  %v1736_v30 = vpop.f32.mrf.mxu1 }
 0x192   : > { %2154 = vst [vmem:[%s4287_s29 + $0x68] sm:$0xff] %v1748_v27  ;;  %v1775_v32 = vpop.f32.mrf.mxu0  ;;  %v627_v27 = vperm.slane %v588_v3, 6 }
 0x193   : > { %2155 = vst [vmem:[%s4287_s29 + $0x70] sm:$0xff] %v1761_v29 }
 0x197   : > { %v1749_v35 = vpop.f32.mrf.mxu2 }
 0x198   : > { %v1762_v37 = vpop.f32.mrf.mxu3  ;;  %v589_v35 = vld [vmem:[%s4260_s28 + $0x20] sm:$0xff] }
 0x199   : > { %v1786_v38 = vpop.f32.mrf.mxu1 }
 0x19a   : > { %v1787_v39 = vadd.f32 %v1786_v38, %v613_v34  ;;  %v1825_v40 = vpop.f32.mrf.mxu0  ;;  %v632_v38 = vperm.slane %v589_v35, 3 }
 0x19b   : > { %v1826_v41 = vadd.f32 %v1825_v40, %v616_v36  ;;  %v629_v36 = vperm.slane %v589_v35, 0 }
 0x19c   : > { %2157 = vst [vmem:[%s4287_s29 + $0x80] sm:$0xff] %v1787_v39 }
 0x19d   : > { %2160 = vst [vmem:[%s4287_s29 + $0x98] sm:$0xff] %v1826_v41 }
 0x19f   : > { %v1799_v44 = vpop.f32.mrf.mxu2 }
 0x1a0   : > { %v1800_v45 = vadd.f32 %v1799_v44, %v614_v42  ;;  %v1812_v46 = vpop.f32.mrf.mxu3  ;;  %v630_v44 = vperm.slane %v589_v35, 1 }
 0x1a1   : > { %v1813_v47 = vadd.f32 %v1812_v46, %v615_v43  ;;  %v1788_v48 = vpop.f32.mrf.mxu1 }
 0x1a2   : > { %2158 = vst [vmem:[%s4287_s29 + $0x88] sm:$0xff] %v1800_v45  ;;  %v1827_v50 = vpop.f32.mrf.mxu0  ;;  %v631_v45 = vperm.slane %v589_v35, 2 }
 0x1a3   : > { %2159 = vst [vmem:[%s4287_s29 + $0x90] sm:$0xff] %v1813_v47 }
 0x1a7   : > { %v1801_v52 = vpop.f32.mrf.mxu2 }
 0x1a8   : > { %v1814_v54 = vpop.f32.mrf.mxu3 }
 0x1a9   : > { %v1838_v55 = vpop.f32.mrf.mxu1 }
 0x1aa   : > { %v1839_v56 = vadd.f32 %v1838_v55, %v617_v51  ;;  %v1877_v57 = vpop.f32.mrf.mxu0  ;;  %v636_v55 = vperm.slane %v589_v35, 7 }
 0x1ab   : > { %v1878_v58 = vadd.f32 %v1877_v57, %v620_v53  ;;  %v633_v53 = vperm.slane %v589_v35, 4 }
 0x1ac   : > { %2161 = vst [vmem:[%s4287_s29 + $0xa0] sm:$0xff] %v1839_v56 }
 0x1ad   : > { %2164 = vst [vmem:[%s4287_s29 + $0xb8] sm:$0xff] %v1878_v58 }
 0x1af   : > { %v1851_v61 = vpop.f32.mrf.mxu2 }
 0x1b0   : > { %v1852_v62 = vadd.f32 %v1851_v61, %v618_v59  ;;  %v1864_v63 = vpop.f32.mrf.mxu3  ;;  %v634_v61 = vperm.slane %v589_v35, 5 }
 0x1b1   : > { %v1865_v0 = vadd.f32 %v1864_v63, %v619_v60  ;;  %v1840_v1 = vpop.f32.mrf.mxu1 }
 0x1b2   : > { %2162 = vst [vmem:[%s4287_s29 + $0xa8] sm:$0xff] %v1852_v62  ;;  %v1879_v2 = vpop.f32.mrf.mxu0  ;;  %v635_v62 = vperm.slane %v589_v35, 6 }
 0x1b3   : > { %2163 = vst [vmem:[%s4287_s29 + $0xb0] sm:$0xff] %v1865_v0 }
 0x1b7   : > { %v1853_v5 = vpop.f32.mrf.mxu2 }
 0x1b8   : > { %v1866_v7 = vpop.f32.mrf.mxu3  ;;  %v590_v5 = vld [vmem:[%s4260_s28 + $0x28] sm:$0xf] }
 0x1b9   : > { %v1890_v8 = vpop.f32.mrf.mxu1 }
 0x1ba   : > { %v1891_v31 = vadd.f32 %v1890_v8, %v621_v4  ;;  %v1929_v9 = vpop.f32.mrf.mxu0  ;;  %v640_v8 = vperm.slane %v590_v5, 3 }
 0x1bb   : > { %v1930_v10 = vadd.f32 %v1929_v9, %v624_v6  ;;  %v637_v6 = vperm.slane %v590_v5, 0 }
 0x1bc   : > { %2165 = vst [vmem:[%s4287_s29 + $0xc0] sm:$0xff] %v1891_v31 }
 0x1bd   : > { %2168 = vst [vmem:[%s4287_s29 + $0xd8] sm:$0xff] %v1930_v10 }
 0x1bf   : > { %v1903_v13 = vpop.f32.mrf.mxu2 }
 0x1c0   : > { %v1904_v14 = vadd.f32 %v1903_v13, %v622_v11  ;;  %v1916_v15 = vpop.f32.mrf.mxu3 }
 0x1c1   : > { %v1917_v16 = vadd.f32 %v1916_v15, %v623_v12  ;;  %v1892_v17 = vpop.f32.mrf.mxu1 }
 0x1c2   : > { %2166 = vst [vmem:[%s4287_s29 + $0xc8] sm:$0xff] %v1904_v14  ;;  %v1931_v18 = vpop.f32.mrf.mxu0  ;;  %v638_v14 = vperm.slane %v590_v5, 1 }
 0x1c3   : > { %2167 = vst [vmem:[%s4287_s29 + $0xd0] sm:$0xff] %v1917_v16  ;;  %v639_v16 = vperm.slane %v590_v5, 2  ;;  %v2182_v18 = vlaneseq }
 0x1c7   : > { %v1905_v20 = vpop.f32.mrf.mxu2 }
 0x1c8   : > { %v1918_v49 = vpop.f32.mrf.mxu3 }
 0x1c9   : > { %v1942_v22 = vpop.f32.mrf.mxu1 }
 0x1ca   : > { %v1943_v23 = vadd.f32 %v1942_v22, %v625_v19  ;;  %v1981_v24 = vpop.f32.mrf.mxu0 }
 0x1cb   : > { %v1982_v25 = vadd.f32 %v1981_v24, %v628_v21 }
 0x1cc   : > { %2169 = vst [vmem:[%s4287_s29 + $0xe0] sm:$0xff] %v1943_v23 }
 0x1cd   : > { %2172 = vst [vmem:[%s4287_s29 + $0xf8] sm:$0xff] %v1982_v25 }
 0x1cf   : > { %v1955_v28 = vpop.f32.mrf.mxu2 }
 0x1d0   : > { %v1956_v29 = vadd.f32 %v1955_v28, %v626_v26  ;;  %v1968_v30 = vpop.f32.mrf.mxu3  ;;  %v2183_v26 = vand.u32 127, %v2182_v18  ;;  %v2187_v28 = vstv %s3204_s11 }
 0x1d1   : > { %v1969_v32 = vadd.f32 %v1968_v30, %v627_v27  ;;  %v1944_v33 = vpop.f32.mrf.mxu1 }
 0x1d2   : > { %2170 = vst [vmem:[%s4287_s29 + $0xe8] sm:$0xff] %v1956_v29  ;;  %v1983_v34 = vpop.f32.mrf.mxu0  ;;  %v2188_v33 = vadd.s32 %v2187_v28, %v2183_v26 }
 0x1d3   : > { %2171 = vst [vmem:[%s4287_s29 + $0xf0] sm:$0xff] %v1969_v32  ;;  %v2186_v34 = vadd.s32 384, %v2183_v26 }
 0x1d7   : > { %v1957_v37 = vpop.f32.mrf.mxu2 }
 0x1d8   : > { %v1970_v39 = vpop.f32.mrf.mxu3  ;;  %v2184_v37 = vadd.s32 128, %v2183_v26 }
 0x1d9   : > { %v1994_v40 = vpop.f32.mrf.mxu1 }
 0x1da   : > { %v1995_v41 = vadd.f32 %v1994_v40, %v629_v36  ;;  %v2033_v42 = vpop.f32.mrf.mxu0  ;;  %v2185_v40 = vadd.s32 256, %v2183_v26 }
 0x1db   : > { %v2034_v43 = vadd.f32 %v2033_v42, %v632_v38  ;;  %v2196_v42 = vand.u32 31, %v2188_v33 }
 0x1dc   : > { %2173 = vst [vmem:[%s4287_s29 + $0x100] sm:$0xff] %v1995_v41  ;;  %v2192_v41 = vshra.s32 %v2188_v33, 5 }
 0x1dd   : > { %2176 = vst [vmem:[%s4287_s29 + $0x118] sm:$0xff] %v2034_v43  ;;  %v2191_v43 = vadd.s32 %v2187_v28, %v2186_v34 }
 0x1de   : > { %vm4405_vm2 = vcmp.eq.s32.totalorder %v2192_v41, %v2196_v42 }
 0x1df   : > { %v2007_v46 = vpop.f32.mrf.mxu2 }
 0x1e0   : > { %v2008_v47 = vadd.f32 %v2007_v46, %v630_v44  ;;  %v2020_v48 = vpop.f32.mrf.mxu3 }
 0x1e1   : > { %v2021_v50 = vadd.f32 %v2020_v48, %v631_v45  ;;  %v1996_v51 = vpop.f32.mrf.mxu1  ;;  %v2189_v48 = vadd.s32 %v2187_v28, %v2184_v37 }
 0x1e2   : > { %2174 = vst [vmem:[%s4287_s29 + $0x108] sm:$0xff] %v2008_v47  ;;  %v2035_v52 = vpop.f32.mrf.mxu0  ;;  %v2190_v51 = vadd.s32 %v2187_v28, %v2185_v40 }
 0x1e3   : > { %2175 = vst [vmem:[%s4287_s29 + $0x110] sm:$0xff] %v2021_v50 }
 0x1e7   : > { %v2009_v54 = vpop.f32.mrf.mxu2 }
 0x1e8   : > { %v2022_v56 = vpop.f32.mrf.mxu3  ;;  %v2195_v54 = vshra.s32 %v2191_v43, 5 }
 0x1e9   : > { %v2046_v57 = vpop.f32.mrf.mxu1 }
 0x1ea   : > { %v2047_v58 = vadd.f32 %v2046_v57, %v633_v53  ;;  %v2085_v59 = vpop.f32.mrf.mxu0  ;;  %v2199_v57 = vand.u32 31, %v2191_v43 }
 0x1eb   : > { %v2086_v60 = vadd.f32 %v2085_v59, %v636_v55 }
 0x1ec   : > { %2177 = vst [vmem:[%s4287_s29 + $0x120] sm:$0xff] %v2047_v58  ;;  %vm4414_vm8 = vcmp.eq.s32.totalorder %v2195_v54, %v2199_v57 }
 0x1ed   : > { %2180 = vst [vmem:[%s4287_s29 + $0x138] sm:$0xff] %v2086_v60  ;;  %v2193_v60 = vshra.s32 %v2189_v48, 5 }
 0x1ef   : > { %v2059_v63 = vpop.f32.mrf.mxu2 }
 0x1f0   : > { %v2060_v0 = vadd.f32 %v2059_v63, %v634_v61  ;;  %v2072_v1 = vpop.f32.mrf.mxu3  ;;  %v2197_v61 = vand.u32 31, %v2189_v48 }
 0x1f1   : > { %v2073_v2 = vadd.f32 %v2072_v1, %v635_v62  ;;  %v2048_v3 = vpop.f32.mrf.mxu1  ;;  %v2198_v1 = vand.u32 31, %v2190_v51 }
 0x1f2   : > { %2178 = vst [vmem:[%s4287_s29 + $0x128] sm:$0xff] %v2060_v0  ;;  %v2087_v4 = vpop.f32.mrf.mxu0  ;;  %v2194_v0 = vshra.s32 %v2190_v51, 5  ;;  %vm4439_vm12 = vcmp.eq.s32.totalorder %v2193_v60, %v2197_v61 }
 0x1f3   : > { %2179 = vst [vmem:[%s4287_s29 + $0x130] sm:$0xff] %v2073_v2 }
 0x1f4   : > { %vm4448_vm15 = vcmp.eq.s32.totalorder %v2194_v0, %v2198_v1 }
 0x1f7   : > { %v2061_v7 = vpop.f32.mrf.mxu2 }
 0x1f8   : > { %v2074_v31 = vpop.f32.mrf.mxu3 }
 0x1f9   : > { %v2098_v9 = vpop.f32.mrf.mxu1 }
 0x1fa   : > { %v2099_v10 = vadd.f32 %v2098_v9, %v637_v6  ;;  %v2137_v11 = vpop.f32.mrf.mxu0 }
 0x1fb   : > { %v2138_v12 = vadd.f32 %v2137_v11, %v640_v8 }
 0x1fc   : > { %v3205_v13 = vmul.f32 -1.442695, %v2099_v10 }
 0x1fd   : > { %v3208_v15 = vmul.f32 -1.442695, %v2138_v12 }
 0x1fe   : > { %3473 = vpow2.f32 %v3205_v13 }
 0x1ff   : > { %3475 = vpow2.f32 %v3208_v15  ;;  %v2111_v17 = vpop.f32.mrf.mxu2 }
 0x200   : > { %v2112_v19 = vadd.f32 %v2111_v17, %v638_v14  ;;  %v2124_v20 = vpop.f32.mrf.mxu3 }
 0x201   : > { %v2125_v21 = vadd.f32 %v2124_v20, %v639_v16  ;;  %v2100_v49 = vpop.f32.mrf.mxu1 }
 0x202   : > { %v3206_v22 = vmul.f32 -1.442695, %v2112_v19  ;;  %v2139_v23 = vpop.f32.mrf.mxu0 }
 0x203   : > { %v3207_v24 = vmul.f32 -1.442695, %v2125_v21 }
 0x204   : > { %v3474_v25 = vpop.eup %3473  ;;  %3477 = vpow2.f32 %v3206_v22 }
 0x205   : > { %v3476_v27 = vpop.eup %3475  ;;  %v2216_v29 = vadd.f32 1.0, %v3474_v25  ;;  %3479 = vpow2.f32 %v3207_v24 }
 0x206   : > { %v4389_v30 = vadd.f32 1.0, %v3476_v27 }
 0x207   : > { %3481 = vrcp.f32 %v2216_v29  ;;  %v2113_v32 = vpop.f32.mrf.mxu2  ;;  %v2229_v55 = vand.u32 2147483647, %v2216_v29  ;;  %v2231_v56 = vand.u32 2147483648, %v2216_v29  ;;  %vm2225_vm4 = vweird.f32 %v2216_v29 }
 0x208   : > { %3483 = vrcp.f32 %v4389_v30  ;;  %v2126_v35 = vpop.f32.mrf.mxu3  ;;  %vm2270_vm5 = vweird.f32 %v4389_v30  ;;  %v2274_v4 = vand.u32 2147483647, %v4389_v30  ;;  %v2276_v8 = vand.u32 2147483648, %v4389_v30 }
 0x209   : > { %vm2230_vm7 = vcmp.eq.f32.partialorder %v2229_v55, 8.507059e+37  ;;  %v2232_v6 = vor.u32 1.1754944e-38, %v2231_v56 }
 0x20a   : > { %v3478_v36 = vpop.eup %3477  ;;  %v2277_v25 = vor.u32 1.1754944e-38, %v2276_v8 }
 0x20b   : > { %v3480_v38 = vpop.eup %3479  ;;  %v4393_v39 = vadd.f32 1.0, %v3478_v36 }
 0x20c   : > { %v4395_v44 = vadd.f32 1.0, %v3480_v38 }
 0x20d   : > { %v3482_v45 = vpop.eup %3481  ;;  %3485 = vrcp.f32 %v4393_v39  ;;  %v2244_v13 = vand.u32 2147483647, %v4393_v39  ;;  %v2246_v14 = vand.u32 2147483648, %v4393_v39  ;;  %vm2240_vm14 = vweird.f32 %v4393_v39 }
 0x20e   : > { %v4398_v46 = vpop.eup %3483  ;;  %v2221_v47 = vmul.f32 %v3482_v45, %v2216_v29  ;;  %3487 = vrcp.f32 %v4395_v44  ;;  %vm2226_vm3 = vweird.f32 %v3482_v45  ;;  %v2261_v18 = vand.u32 2147483648, %v4395_v44 }
 0x20f   : > { %v2266_v50 = vmul.f32 %v4398_v46, %v4389_v30  ;;  %vm2227_vm6 = vmor %vm2225_vm4, %vm2226_vm3  ;;  %vm2271_vm9 = vweird.f32 %v4398_v46  ;;  %v2259_v49 = vand.u32 2147483647, %v4395_v44  ;;  %v2247_v26 = vor.u32 1.1754944e-38, %v2246_v14 }
 0x210   : > { %v2222_v53 = vsub.f32 1.0, %v2221_v47  ;;  %vm4435_vm11 = vmor %vm2270_vm5, %vm2271_vm9  ;;  %vm2255_vm1 = vweird.f32 %v4395_v44  ;;  %vm2245_vm3 = vcmp.eq.f32.partialorder %v2244_v13, 8.507059e+37  ;;  %v2262_v29 = vor.u32 1.1754944e-38, %v2261_v18 }
 0x211   : > { %v2267_v58 = vsub.f32 1.0, %v2266_v50  ;;  %vm2260_vm5 = vcmp.eq.f32.partialorder %v2259_v49, 8.507059e+37 }
 0x212   : > { %v2223_v59 = vmul.f32 %v3482_v45, %v2222_v53 }
 0x213   : > { %v3486_v62 = vpop.eup %3485  ;;  %v2268_v63 = vmul.f32 %v4398_v46, %v2267_v58 }
 0x214   : > { %v3488_v2 = vpop.eup %3487  ;;  %v2224_v3 = vadd.f32 %v3482_v45, %v2223_v59  ;;  %v2236_v5 = vmul.f32 %v3486_v62, %v4393_v39  ;;  %vm2241_vm10 = vweird.f32 %v3486_v62 }
 0x215   : > { %v2251_v31 = vmul.f32 %v3488_v2, %v4395_v44  ;;  %v2269_v10 = vadd.f32 %v4398_v46, %v2268_v63  ;;  %vm2256_vm13 = vweird.f32 %v3488_v2  ;;  %vm2242_vm0 = vmor %vm2240_vm14, %vm2241_vm10 }
 0x216   : > { %v2228_v9 = vsel %vm2227_vm6, %v3482_v45, %v2224_v3  ;;  %v2237_v11 = vsub.f32 1.0, %v2236_v5  ;;  %vm2257_vm4 = vmor %vm2255_vm1, %vm2256_vm13 }
 0x217   : > { %v2233_v12 = vsel %vm2230_vm7, %v2232_v6, %v2228_v9  ;;  %v2252_v15 = vsub.f32 1.0, %v2251_v31  ;;  %v2273_v22 = vsel %vm4435_vm11, %v4398_v46, %v2269_v10 }
 0x218   : > { %v2280_v16 = vsel %vm4405_vm2, 0.0, %v2233_v12  ;;  %v2238_v17 = vmul.f32 %v3486_v62, %v2237_v11  ;;  %vm2275_vm2 = vcmp.eq.f32.partialorder %v2274_v4, 8.507059e+37 }
 0x219   : > { %2284 = vst [vmem:[%s4423_s24] sm:$0xff] %v2280_v16  ;;  %v2253_v21 = vmul.f32 %v3488_v2, %v2252_v15  ;;  %v2278_v30 = vsel %vm2275_vm2, %v2277_v25, %v2273_v22 }
 0x21a   : > { %v2239_v23 = vadd.f32 %v3486_v62, %v2238_v17  ;;  %v2283_v37 = vsel %vm4414_vm8, 0.0, %v2278_v30 }
 0x21b   : > { %v2254_v27 = vadd.f32 %v3488_v2, %v2253_v21  ;;  %2287 = vst [vmem:[%s4423_s24 + $0x18] sm:$0xff] %v2283_v37 }
 0x21c   : > { %v2243_v28 = vsel %vm2242_vm0, %v3486_v62, %v2239_v23 }
 0x21d   : > { %v2248_v32 = vsel %vm2245_vm3, %v2247_v26, %v2243_v28  ;;  %v2258_v33 = vsel %vm2257_vm4, %v3488_v2, %v2254_v27 }
 0x21e   : > { %v2281_v34 = vsel %vm4439_vm12, 0.0, %v2248_v32  ;;  %v2263_v35 = vsel %vm2260_vm5, %v2262_v29, %v2258_v33 }
 0x21f   : > { %2285 = vst [vmem:[%s4423_s24 + $0x8] sm:$0xff] %v2281_v34  ;;  %v2282_v36 = vsel %vm4448_vm15, 0.0, %v2263_v35 }
 0x220   : > { %2286 = vst [vmem:[%s4423_s24 + $0x10] sm:$0xff] %v2282_v36 }
 0x221 PF: > { %p19_p5 = scmp.ge.s32.totalorder %s3773_s10, 4   ;;  %s4505_s21 = smov %s3673_s22 }
 0x222   : > { %s4506_s22 = smov %s3677_s23  ;;  %s4507_s23 = smov %s3785_s15 }
 0x223   : > { %s4508_s24 = smov %s3773_s10  ;;  %21 = sbr.rel (!%p19_p5) target bundleno = 9 (0x9), region = 116 }
 0x228   :  { %2327 = vsyncpa [#allocation3], 1 }
 0x229   :  { %2329 = vsyncpa [#allocation3 + $0x1], 1 }
 0x22a   :  { %2330 = vsyncpa [#allocation5], 1 }
 0x22b   :  { %2331 = vsyncpa [#allocation8], 1 }
 0x22c   :  { %2333 = vsyncpa [#allocation8 + $0x1], 1 }

</bundles_post_ra>
